<compile_context>
chip_gen: v7x
topology: tpu7x:2x2x1
jax: 0.10.0
libtpu: 0.0.40
codegen_flags: <defaults>
</compile_context>

<pallas_src>
import numpy as np

import jax
import jax.numpy as jnp
from jax.experimental import pallas as pl
from jax.experimental.pallas import tpu as pltpu

PSP_SIZES = (1, 3, 6, 8)
BN_EPS = 1e-5
LANE = 128
_NEG_INF = -1e30


def _round_up(n, m=LANE):
    return ((n + m - 1) // m) * m


def _vmem_limit_bytes():
    """Scoped-VMEM budget derived from the chip generation (v5e/v6e: 128 MiB,
    v7x: 64 MiB per TensorCore), leaving ~1/8 headroom for Mosaic scratch."""
    cap = 64 * 1024 * 1024
    try:
        cap = int(pltpu.get_tpu_info().vmem_capacity_bytes)
    except Exception:
        pass
    return max(32 * 1024 * 1024, min(cap - cap // 8, 112 * 1024 * 1024))


def _pick_spatial_tile(S, Cp, Kcp, Vcp, Cop, PPp, vmem_budget):
    """Largest 128-multiple spatial tile whose (double-buffered) working set fits
    the scoped-VMEM budget.  Channel-aware so large-channel configs still compile
    (critical on v7x's 64 MiB) and small-channel configs get big tiles."""
    # Constant operands (weights + pooled key/value), conservatively counted as
    # double-buffered bf16 even when single-buffering succeeds.
    fixed = 2 * 2 * (Cp * Kcp + Cp * Vcp + Vcp * Cop + Cop * Cop + Cp * Cop
                     + Kcp * PPp + PPp * Vcp)
    fixed += 4 * 1024 * 1024      # biases, semaphores, Mosaic-internal scratch slack
    s_cap = max(LANE, _round_up(S, LANE))
    for ts in (2048, 1024, 512, 256, 128):
        if ts > s_cap:
            continue
        streamed = 2 * (ts * Cp * 2 + ts * max(Cop, PPp) * 2)   # x + (out | P) tiles, bf16, 2 bufs
        temps = 4 * ts * (Kcp + PPp + Vcp + 2 * Cop)            # f32 q/sim/ctx/out intermediates
        if fixed + streamed + temps <= vmem_budget:
            return ts
    return LANE


def build_psp_matrix(H, W, sizes=PSP_SIZES):
    """Pooling matrix P of shape (sum(s^2), H*W) reproducing
    torch.nn.AdaptiveAvgPool2d bin boundaries (start=floor(i*in/out),
    end=ceil((i+1)*in/out)), concatenated over sizes, row-major flattening."""
    rows = []
    for s in sizes:
        for i in range(s):
            rs = (i * H) // s
            re = -(-((i + 1) * H) // s)
            for j in range(s):
                cs = (j * W) // s
                ce = -(-((j + 1) * W) // s)
                m = np.zeros((H, W), np.float32)
                m[rs:re, cs:ce] = 1.0 / float((re - rs) * (ce - cs))
                rows.append(m.reshape(-1))
    return np.stack(rows, axis=0)  # (PP, H*W)


# -------------------- phase 1: key/value transform + PSP pooling (accumulated) ---------
def psp_pool_kernel(x_ref, p_ref, wk_ref, bk_ref, wv_ref, bv_ref, keyp_ref, valp_ref):
    @pl.when(pl.program_id(2) == 0)
    def _():
        keyp_ref[...] = jnp.zeros_like(keyp_ref)
        valp_ref[...] = jnp.zeros_like(valp_ref)

    x = x_ref[...]                                                        # (TS, Cp) bf16

    # f_key (== f_query): conv1x1 + folded eval-BN + ReLU (f32 elementwise math)
    k = jnp.maximum(
        jnp.dot(x, wk_ref[...], preferred_element_type=jnp.float32) + bk_ref[...], 0.0)
    # f_value: conv1x1
    v = jnp.dot(x, wv_ref[...], preferred_element_type=jnp.float32) + bv_ref[...]

    # PSP pooling accumulated tile-by-tile (zero-padded spatial columns of P
    # make padded x rows contribute exactly zero).
    p = p_ref[...]                                                        # (PPp, TS) bf16
    keyp_ref[...] += jnp.dot(p, k.astype(jnp.bfloat16), preferred_element_type=jnp.float32)
    valp_ref[...] += jnp.dot(p, v.astype(jnp.bfloat16), preferred_element_type=jnp.float32)


# -------------------- phase 2: attention + W projection + final conv/BN/ReLU -----------
def apnb_attn_kernel(x_ref, keypt_ref, valp_ref, wq_ref, bq_ref, mask_ref,
                     ww_ref, bw_ref, wfc_ref, wfx_ref, bf_ref, out_ref):
    x = x_ref[...]                                                        # (TS, Cp) bf16

    # query transform (same fused conv+BN+ReLU as f_key); the key_channels**-0.5
    # softmax scale is folded into wq/bq (ReLU is positively homogeneous).
    q = jnp.maximum(
        jnp.dot(x, wq_ref[...], preferred_element_type=jnp.float32) + bq_ref[...], 0.0)

    # sim = (scale*q) @ key_p^T : key_p arrives pre-transposed as (Kcp, PPp) bf16,
    # so this is a plain (M,K)@(K,N) MXU matmul (no per-tile transposed contraction).
    sim = jnp.dot(q.astype(jnp.bfloat16), keypt_ref[...],
                  preferred_element_type=jnp.float32)                     # (TS, PPp)
    sim = sim + mask_ref[...]          # additive -inf mask on zero-padded pooled positions

    sim = sim - jnp.max(sim, axis=-1, keepdims=True)
    e = jnp.exp(sim)
    sm = e * pl.reciprocal(jnp.sum(e, axis=-1, keepdims=True), approx=True)

    # context aggregation + W projection (W is constant-zero initialized in the module)
    ctx = jnp.dot(sm.astype(jnp.bfloat16), valp_ref[...],
                  preferred_element_type=jnp.float32)                     # (TS, Vcp)
    ctx = jnp.dot(ctx.astype(jnp.bfloat16), ww_ref[...],
                  preferred_element_type=jnp.float32) + bw_ref[...]       # (TS, Cop)

    # conv_bn_dropout(concat([context, x], channel)): concat folded into a split
    # matmul, eval-BN affine folded into wfc/wfx/bf; Dropout2d is identity in eval.
    out = (jnp.dot(ctx.astype(jnp.bfloat16), wfc_ref[...], preferred_element_type=jnp.float32)
           + jnp.dot(x, wfx_ref[...], preferred_element_type=jnp.float32)
           + bf_ref[...])
    out_ref[...] = jnp.maximum(out, 0.0).astype(out_ref.dtype)


def init_params(key, in_channels, out_channels, key_channels, value_channels, H, W):
    ks = jax.random.split(key, 6)
    scale = 0.1
    bn_scale = 1.0 / np.sqrt(1.0 + BN_EPS)   # gamma=1, running_var=1
    bn_shift = 0.0                            # beta=0, running_mean=0
    params = dict(
        psp=jnp.asarray(build_psp_matrix(H, W)),                              # (PP, H*W)
        wk=scale * jax.random.normal(ks[0], (in_channels, key_channels), jnp.float32),
        bk=scale * jax.random.normal(ks[1], (1, key_channels), jnp.float32),
        sk=jnp.full((1, key_channels), bn_scale, jnp.float32),
        hk=jnp.full((1, key_channels), bn_shift, jnp.float32),
        wv=scale * jax.random.normal(ks[2], (in_channels, value_channels), jnp.float32),
        bv=scale * jax.random.normal(ks[3], (1, value_channels), jnp.float32),
        # W of the self-attention block is constant-zero initialized in the module
        ww=jnp.zeros((value_channels, out_channels), jnp.float32),
        bw=jnp.zeros((1, out_channels), jnp.float32),
        wf=scale * jax.random.normal(ks[4], (out_channels + in_channels, out_channels), jnp.float32),
        bf=scale * jax.random.normal(ks[5], (1, out_channels), jnp.float32),
        sf=jnp.full((1, out_channels), bn_scale, jnp.float32),
        hf=jnp.full((1, out_channels), bn_shift, jnp.float32),
    )
    return params


def _apnb_forward_impl(x_nchw, params, *, key_channels, out_channels,
                       single_buffer_weights, kernel_out_dtype=jnp.bfloat16):
    N, C, H, W = x_nchw.shape
    S = H * W
    Kc = params["wk"].shape[1]
    Vc = params["wv"].shape[1]
    Co = out_channels
    PP = params["psp"].shape[0]

    # lane-dense padded dims + VMEM-aware spatial tiling
    Cp, Kcp, Vcp, Cop, PPp = (_round_up(d) for d in (C, Kc, Vc, Co, PP))
    vmem_limit = _vmem_limit_bytes()
    TS = _pick_spatial_tile(S, Cp, Kcp, Vcp, Cop, PPp, vmem_limit)
    Sp = _round_up(S, TS)                       # pad S instead of using one huge tile
    n_tiles = Sp // TS
    n_split = 2 if (n_tiles % 2 == 0 and n_tiles >= 2) else 1   # 2nd parallel axis for v7x's 2 TCs
    tps = n_tiles // n_split

    sm_scale = float(key_channels) ** (-0.5)

    # --- fold conv bias + eval-mode BN affine (and the softmax scale, query side) ---
    wk_f = params["wk"] * params["sk"]
    bk_f = params["bk"] * params["sk"] + params["hk"]
    wq_f = wk_f * sm_scale
    bq_f = bk_f * sm_scale
    wf_ctx = params["wf"][:Co, :] * params["sf"]
    wf_x = params["wf"][Co:, :] * params["sf"]
    bf_f = params["bf"] * params["sf"] + params["hf"]

    bf16, f32 = jnp.bfloat16, jnp.float32

    def pad2(a, rows, cols, dtype):
        return jnp.pad(a, ((0, rows - a.shape[0]), (0, cols - a.shape[1]))).astype(dtype)

    wk_p = pad2(wk_f, Cp, Kcp, bf16)
    bk_p = pad2(bk_f, 1, Kcp, f32)
    wq_p = pad2(wq_f, Cp, Kcp, bf16)
    bq_p = pad2(bq_f, 1, Kcp, f32)
    wv_p = pad2(params["wv"], Cp, Vcp, bf16)
    bv_p = pad2(params["bv"], 1, Vcp, f32)
    ww_p = pad2(params["ww"], Vcp, Cop, bf16)
    bw_p = pad2(params["bw"], 1, Cop, f32)
    wfc_p = pad2(wf_ctx, Cop, Cop, bf16)
    wfx_p = pad2(wf_x, Cp, Cop, bf16)
    bf_p = pad2(bf_f, 1, Cop, f32)
    psp_p = pad2(params["psp"], PPp, Sp, bf16)        # zero rows beyond PP, zero cols beyond S

    # additive softmax mask for the zero-padded pooled positions
    mask_p = jnp.asarray(np.concatenate(
        [np.zeros((1, PP), np.float32), np.full((1, PPp - PP), _NEG_INF, np.float32)], axis=1))

    x_flat = jnp.transpose(x_nchw, (0, 2, 3, 1)).reshape(N, S, C)
    x_pad = jnp.pad(x_flat, ((0, 0), (0, Sp - S), (0, Cp - C))).astype(bf16)   # (N, Sp, Cp)

    def const_spec(shape, index_map):
        # Constant-index weight/bias blocks never change across the grid:
        # single-buffer them to halve their VMEM footprint (critical at real
        # channel counts on v7x).  Fallback path uses default double-buffering.
        if single_buffer_weights:
            return pl.BlockSpec(shape, index_map, pipeline_mode=pl.Buffered(buffer_count=1))
        return pl.BlockSpec(shape, index_map)

    c1 = lambda n, c, s: (0, 0)        # phase-1 constant operands
    c2 = lambda n, s: (0, 0)           # phase-2 constant operands

    # ---- phase 1: pooled key/value, accumulated across spatial tiles ----
    keyp_part, valp_part = pl.pallas_call(
        psp_pool_kernel,
        out_shape=(jax.ShapeDtypeStruct((N, n_split, PPp, Kcp), f32),
                   jax.ShapeDtypeStruct((N, n_split, PPp, Vcp), f32)),
        grid=(N, n_split, tps),
        in_specs=[
            pl.BlockSpec((pl.Squeezed(), TS, Cp),
                         lambda n, c, s: (n, c * tps + s, 0)),               # x tile
            pl.BlockSpec((PPp, TS), lambda n, c, s: (0, c * tps + s)),        # P column tile
            const_spec((Cp, Kcp), c1), const_spec((1, Kcp), c1),
            const_spec((Cp, Vcp), c1), const_spec((1, Vcp), c1),
        ],
        out_specs=(
            pl.BlockSpec((pl.Squeezed(), pl.Squeezed(), PPp, Kcp),
                         lambda n, c, s: (n, c, 0, 0)),
            pl.BlockSpec((pl.Squeezed(), pl.Squeezed(), PPp, Vcp),
                         lambda n, c, s: (n, c, 0, 0)),
        ),
        compiler_params=pltpu.CompilerParams(
            dimension_semantics=("parallel", "parallel", "arbitrary"),
            vmem_limit_bytes=vmem_limit),
    )(x_pad, psp_p, wk_p, bk_p, wv_p, bv_p)

    # tiny XLA glue: reduce split partials, pre-transpose the pooled key so phase 2's
    # sim is a plain matmul, and cast both pooled tensors to bf16 (no per-tile casts).
    keyp_t = jnp.swapaxes(jnp.sum(keyp_part, axis=1), 1, 2).astype(bf16)      # (N, Kcp, PPp)
    valp_b = jnp.sum(valp_part, axis=1).astype(bf16)                          # (N, PPp, Vcp)

    # ---- phase 2: per-tile attention + final conv (both axes parallel -> megacore) ----
    out_flat = pl.pallas_call(
        apnb_attn_kernel,
        out_shape=jax.ShapeDtypeStruct((N, Sp, Cop), kernel_out_dtype),
        grid=(N, n_tiles),
        in_specs=[
            pl.BlockSpec((pl.Squeezed(), TS, Cp), lambda n, s: (n, s, 0)),    # x tile
            pl.BlockSpec((pl.Squeezed(), Kcp, PPp), lambda n, s: (n, 0, 0)),  # pooled key^T
            pl.BlockSpec((pl.Squeezed(), PPp, Vcp), lambda n, s: (n, 0, 0)),  # pooled value
            const_spec((Cp, Kcp), c2), const_spec((1, Kcp), c2),
            const_spec((1, PPp), c2),                                         # softmax mask
            const_spec((Vcp, Cop), c2), const_spec((1, Cop), c2),
            const_spec((Cop, Cop), c2), const_spec((Cp, Cop), c2), const_spec((1, Cop), c2),
        ],
        out_specs=pl.BlockSpec((pl.Squeezed(), TS, Cop), lambda n, s: (n, s, 0)),
        compiler_params=pltpu.CompilerParams(
            dimension_semantics=("parallel", "parallel"),
            vmem_limit_bytes=vmem_limit),
    )(x_pad, keyp_t, valp_b, wq_p, bq_p, mask_p, ww_p, bw_p, wfc_p, wfx_p, bf_p)

    out = out_flat[:, :S, :Co].astype(x_nchw.dtype).reshape(N, H, W, Co)
    # TODO(synk): a channels-last consumer could skip this final NCHW transpose.
    return jnp.transpose(out, (0, 3, 1, 2))


def apnb_forward(x_nchw, params, *, key_channels, out_channels):
    """x_nchw: (N, C, H, W) float32 -> (N, out_channels, H, W) float32 (eval-mode APNB)."""
    try:
        return _apnb_forward_impl(x_nchw, params, key_channels=key_channels,
                                  out_channels=out_channels, single_buffer_weights=True)
    except Exception:
        # pl.Buffered(1) single-buffering of constant operands is purely a VMEM
        # optimization; fall back to default double-buffered specs if this
        # JAX/Mosaic build does not support pipeline_mode on pallas_call.
        return _apnb_forward_impl(x_nchw, params, key_channels=key_channels,
                                  out_channels=out_channels, single_buffer_weights=False)


def apnb_dict_forward(x_dict, params, *, key_channels, out_channels):
    """Replicates the dict-walking glue of APNB.forward: for the first non-str
    frame_id, runs the block on x[frame_id][4] and writes the result back."""
    for frame_id in x_dict.keys():
        if not isinstance(frame_id, str):
            for idx in range(5):
                if idx in [4]:
                    tmp = x_dict[frame_id][idx]
                    x_dict[frame_id][idx] = apnb_forward(
                        tmp, params, key_channels=key_channels, out_channels=out_channels)
                    return x_dict


if __name__ == "__main__":
    # Small, module-consistent shapes.
    N, C, H, W = 2, 4, 16, 16          # in_channels = 4
    out_channels = C                   # APNB concat requires attention-out == in_channels
    key_channels = 2
    value_channels = 2

    root = jax.random.PRNGKey(0)
    k_x, k_p = jax.random.split(root)
    x = jax.random.normal(k_x, (N, C, H, W), jnp.float32)

    params = init_params(k_p, C, out_channels, key_channels, value_channels, H, W)

    # Mimic the APNB dict interface: x[frame_id] is a list of 5 feature maps; idx 4 is processed.
    x_dict = {0: [None, None, None, None, x]}
    result = apnb_dict_forward(x_dict, params,
                               key_channels=key_channels, out_channels=out_channels)
    out = result[0][4]
    jax.block_until_ready(out)
    assert out.shape == (N, out_channels, H, W)
    assert bool(jnp.all(jnp.isfinite(out)))
    print("KERNEL_OK")
</pallas_src>

<mosaic_0001>
module attributes {stable_mosaic.version = 11 : i64} {
  func.func @psp_pool_kernel(%arg0: i32, %arg1: i32, %arg2: i32, %arg3: memref<1x256x128xbf16, #tpu.memory_space<vmem>>, %arg4: memref<128x256xbf16, #tpu.memory_space<vmem>>, %arg5: memref<128x128xbf16, #tpu.memory_space<vmem>>, %arg6: memref<1x128xf32, #tpu.memory_space<vmem>>, %arg7: memref<128x128xbf16, #tpu.memory_space<vmem>>, %arg8: memref<1x128xf32, #tpu.memory_space<vmem>>, %arg9: memref<1x1x128x128xf32, #tpu.memory_space<vmem>>, %arg10: memref<1x1x128x128xf32, #tpu.memory_space<vmem>>) attributes {dimension_semantics = [#tpu.dimension_semantics<parallel>, #tpu.dimension_semantics<parallel>, #tpu.dimension_semantics<arbitrary>], iteration_bounds = array<i64: 2, 1, 1>, scalar_prefetch = 0 : i64, scratch_operands = 0 : i64, tpu.core_type = #tpu.core_type<tc>, window_params = [{transform_indices = @transform_0, window_bounds = array<i64: 1, 256, 128>}, {transform_indices = @transform_1, window_bounds = array<i64: 128, 256>}, {pipeline_mode = #tpu.pipeline_mode<synchronous>, transform_indices = @transform_2, window_bounds = array<i64: 128, 128>}, {pipeline_mode = #tpu.pipeline_mode<synchronous>, transform_indices = @transform_3, window_bounds = array<i64: 1, 128>}, {pipeline_mode = #tpu.pipeline_mode<synchronous>, transform_indices = @transform_4, window_bounds = array<i64: 128, 128>}, {pipeline_mode = #tpu.pipeline_mode<synchronous>, transform_indices = @transform_5, window_bounds = array<i64: 1, 128>}, {transform_indices = @transform_6, window_bounds = array<i64: 1, 1, 128, 128>}, {transform_indices = @transform_7, window_bounds = array<i64: 1, 1, 128, 128>}]} {
    %c0_i32 = arith.constant 0 : i32
    %0 = arith.cmpi eq, %arg2, %c0_i32 : i32
    %1 = arith.extui %0 : i1 to i32
    %c0_i32_0 = arith.constant 0 : i32
    %2 = arith.cmpi ne, %1, %c0_i32_0 : i32
    scf.if %2 {
      %cst_33 = arith.constant 0.000000e+00 : f32
      %34 = vector.broadcast %cst_33 : f32 to vector<128x128xf32>
      %c0_34 = arith.constant 0 : index
      %c0_35 = arith.constant 0 : index
      %c0_36 = arith.constant 0 : index
      %c0_37 = arith.constant 0 : index
      %35 = vector.load %arg9[%c0_34, %c0_35, %c0_36, %c0_37] : memref<1x1x128x128xf32, #tpu.memory_space<vmem>>, vector<1x1x128x128xf32>
      %36 = vector.shape_cast %35 : vector<1x1x128x128xf32> to vector<128x128xf32>
      %37 = vector.shape_cast %34 : vector<128x128xf32> to vector<1x1x128x128xf32>
      tpu.vector_store %arg9[%c0_34, %c0_35, %c0_36, %c0_37], %37 {strides = array<i32>} : memref<1x1x128x128xf32, #tpu.memory_space<vmem>>, vector<1x1x128x128xf32>,
      %cst_38 = arith.constant 0.000000e+00 : f32
      %38 = vector.broadcast %cst_38 : f32 to vector<128x128xf32>
      %c0_39 = arith.constant 0 : index
      %c0_40 = arith.constant 0 : index
      %c0_41 = arith.constant 0 : index
      %c0_42 = arith.constant 0 : index
      %39 = vector.load %arg10[%c0_39, %c0_40, %c0_41, %c0_42] : memref<1x1x128x128xf32, #tpu.memory_space<vmem>>, vector<1x1x128x128xf32>
      %40 = vector.shape_cast %39 : vector<1x1x128x128xf32> to vector<128x128xf32>
      %41 = vector.shape_cast %38 : vector<128x128xf32> to vector<1x1x128x128xf32>
      tpu.vector_store %arg10[%c0_39, %c0_40, %c0_41, %c0_42], %41 {strides = array<i32>} : memref<1x1x128x128xf32, #tpu.memory_space<vmem>>, vector<1x1x128x128xf32>,
    } else {
    }
    %c0 = arith.constant 0 : index
    %c0_1 = arith.constant 0 : index
    %c0_2 = arith.constant 0 : index
    %3 = vector.load %arg3[%c0, %c0_1, %c0_2] : memref<1x256x128xbf16, #tpu.memory_space<vmem>>, vector<1x256x128xbf16>
    %4 = vector.shape_cast %3 : vector<1x256x128xbf16> to vector<256x128xbf16>
    %c0_3 = arith.constant 0 : index
    %c0_4 = arith.constant 0 : index
    %5 = vector.load %arg5[%c0_3, %c0_4] : memref<128x128xbf16, #tpu.memory_space<vmem>>, vector<128x128xbf16>
    %cst = arith.constant dense<0.000000e+00> : vector<256x128xf32>
    %6 = tpu.matmul %4, %5, %cst {dimension_numbers = #tpu.dot_dimension_numbers<[1], [0], [0], [1], [0, 0, 1, 1], [], []>} : vector<256x128xbf16>, vector<128x128xbf16>, vector<256x128xf32> -> vector<256x128xf32>
    %c0_5 = arith.constant 0 : index
    %c0_6 = arith.constant 0 : index
    %7 = vector.load %arg6[%c0_5, %c0_6] : memref<1x128xf32, #tpu.memory_space<vmem>>, vector<1x128xf32>
    %8 = vector.broadcast %7 : vector<1x128xf32> to vector<256x128xf32>
    %9 = arith.addf %6, %8 : vector<256x128xf32>
    %cst_7 = arith.constant 0.000000e+00 : f32
    %10 = vector.broadcast %cst_7 : f32 to vector<256x128xf32>
    %11 = arith.maximumf %9, %10 : vector<256x128xf32>
    %c0_8 = arith.constant 0 : index
    %c0_9 = arith.constant 0 : index
    %12 = vector.load %arg7[%c0_8, %c0_9] : memref<128x128xbf16, #tpu.memory_space<vmem>>, vector<128x128xbf16>
    %cst_10 = arith.constant dense<0.000000e+00> : vector<256x128xf32>
    %13 = tpu.matmul %4, %12, %cst_10 {dimension_numbers = #tpu.dot_dimension_numbers<[1], [0], [0], [1], [0, 0, 1, 1], [], []>} : vector<256x128xbf16>, vector<128x128xbf16>, vector<256x128xf32> -> vector<256x128xf32>
    %c0_11 = arith.constant 0 : index
    %c0_12 = arith.constant 0 : index
    %14 = vector.load %arg8[%c0_11, %c0_12] : memref<1x128xf32, #tpu.memory_space<vmem>>, vector<1x128xf32>
    %15 = vector.broadcast %14 : vector<1x128xf32> to vector<256x128xf32>
    %16 = arith.addf %13, %15 : vector<256x128xf32>
    %c0_13 = arith.constant 0 : index
    %c0_14 = arith.constant 0 : index
    %17 = vector.load %arg4[%c0_13, %c0_14] : memref<128x256xbf16, #tpu.memory_space<vmem>>, vector<128x256xbf16>
    %c0_15 = arith.constant 0 : index
    %c0_16 = arith.constant 0 : index
    %c0_17 = arith.constant 0 : index
    %c0_18 = arith.constant 0 : index
    %18 = vector.load %arg9[%c0_15, %c0_16, %c0_17, %c0_18] : memref<1x1x128x128xf32, #tpu.memory_space<vmem>>, vector<1x1x128x128xf32>
    %19 = vector.shape_cast %18 : vector<1x1x128x128xf32> to vector<128x128xf32>
    %20 = arith.truncf %11 : vector<256x128xf32> to vector<256x128xbf16>
    %cst_19 = arith.constant dense<0.000000e+00> : vector<128x128xf32>
    %21 = tpu.matmul %17, %20, %cst_19 {dimension_numbers = #tpu.dot_dimension_numbers<[1], [0], [0], [1], [0, 0, 1, 1], [], []>} : vector<128x256xbf16>, vector<256x128xbf16>, vector<128x128xf32> -> vector<128x128xf32>
    %22 = arith.addf %19, %21 : vector<128x128xf32>
    %c0_20 = arith.constant 0 : index
    %c0_21 = arith.constant 0 : index
    %c0_22 = arith.constant 0 : index
    %c0_23 = arith.constant 0 : index
    %23 = vector.load %arg9[%c0_20, %c0_21, %c0_22, %c0_23] : memref<1x1x128x128xf32, #tpu.memory_space<vmem>>, vector<1x1x128x128xf32>
    %24 = vector.shape_cast %23 : vector<1x1x128x128xf32> to vector<128x128xf32>
    %25 = vector.shape_cast %22 : vector<128x128xf32> to vector<1x1x128x128xf32>
    tpu.vector_store %arg9[%c0_20, %c0_21, %c0_22, %c0_23], %25 {strides = array<i32>} : memref<1x1x128x128xf32, #tpu.memory_space<vmem>>, vector<1x1x128x128xf32>,
    %c0_24 = arith.constant 0 : index
    %c0_25 = arith.constant 0 : index
    %c0_26 = arith.constant 0 : index
    %c0_27 = arith.constant 0 : index
    %26 = vector.load %arg10[%c0_24, %c0_25, %c0_26, %c0_27] : memref<1x1x128x128xf32, #tpu.memory_space<vmem>>, vector<1x1x128x128xf32>
    %27 = vector.shape_cast %26 : vector<1x1x128x128xf32> to vector<128x128xf32>
    %28 = arith.truncf %16 : vector<256x128xf32> to vector<256x128xbf16>
    %cst_28 = arith.constant dense<0.000000e+00> : vector<128x128xf32>
    %29 = tpu.matmul %17, %28, %cst_28 {dimension_numbers = #tpu.dot_dimension_numbers<[1], [0], [0], [1], [0, 0, 1, 1], [], []>} : vector<128x256xbf16>, vector<256x128xbf16>, vector<128x128xf32> -> vector<128x128xf32>
    %30 = arith.addf %27, %29 : vector<128x128xf32>
    %c0_29 = arith.constant 0 : index
    %c0_30 = arith.constant 0 : index
    %c0_31 = arith.constant 0 : index
    %c0_32 = arith.constant 0 : index
    %31 = vector.load %arg10[%c0_29, %c0_30, %c0_31, %c0_32] : memref<1x1x128x128xf32, #tpu.memory_space<vmem>>, vector<1x1x128x128xf32>
    %32 = vector.shape_cast %31 : vector<1x1x128x128xf32> to vector<128x128xf32>
    %33 = vector.shape_cast %30 : vector<128x128xf32> to vector<1x1x128x128xf32>
    tpu.vector_store %arg10[%c0_29, %c0_30, %c0_31, %c0_32], %33 {strides = array<i32>} : memref<1x1x128x128xf32, #tpu.memory_space<vmem>>, vector<1x1x128x128xf32>,
    return
  }
  func.func @transform_0(%arg0: i32, %arg1: i32, %arg2: i32) -> (i32, i32, i32) {
    %c1_i32 = arith.constant 1 : i32
    %0 = arith.muli %arg1, %c1_i32 : i32
    %1 = arith.addi %0, %arg2 : i32
    %c0_i32 = arith.constant 0 : i32
    %c0_i32_0 = arith.constant 0 : i32
    return %arg0, %1, %c0_i32 : i32, i32, i32
  }
  func.func @transform_1(%arg0: i32, %arg1: i32, %arg2: i32) -> (i32, i32) {
    %c1_i32 = arith.constant 1 : i32
    %0 = arith.muli %arg1, %c1_i32 : i32
    %1 = arith.addi %0, %arg2 : i32
    %c0_i32 = arith.constant 0 : i32
    %c0_i32_0 = arith.constant 0 : i32
    return %c0_i32, %1 : i32, i32
  }
  func.func @transform_2(%arg0: i32, %arg1: i32, %arg2: i32) -> (i32, i32) {
    %c0_i32 = arith.constant 0 : i32
    %c0_i32_0 = arith.constant 0 : i32
    %c0_i32_1 = arith.constant 0 : i32
    return %c0_i32, %c0_i32_0 : i32, i32
  }
  func.func @transform_3(%arg0: i32, %arg1: i32, %arg2: i32) -> (i32, i32) {
    %c0_i32 = arith.constant 0 : i32
    %c0_i32_0 = arith.constant 0 : i32
    %c0_i32_1 = arith.constant 0 : i32
    return %c0_i32, %c0_i32_0 : i32, i32
  }
  func.func @transform_4(%arg0: i32, %arg1: i32, %arg2: i32) -> (i32, i32) {
    %c0_i32 = arith.constant 0 : i32
    %c0_i32_0 = arith.constant 0 : i32
    %c0_i32_1 = arith.constant 0 : i32
    return %c0_i32, %c0_i32_0 : i32, i32
  }
  func.func @transform_5(%arg0: i32, %arg1: i32, %arg2: i32) -> (i32, i32) {
    %c0_i32 = arith.constant 0 : i32
    %c0_i32_0 = arith.constant 0 : i32
    %c0_i32_1 = arith.constant 0 : i32
    return %c0_i32, %c0_i32_0 : i32, i32
  }
  func.func @transform_6(%arg0: i32, %arg1: i32, %arg2: i32) -> (i32, i32, i32, i32) {
    %c0_i32 = arith.constant 0 : i32
    %c0_i32_0 = arith.constant 0 : i32
    %c0_i32_1 = arith.constant 0 : i32
    return %arg0, %arg1, %c0_i32, %c0_i32_0 : i32, i32, i32, i32
  }
  func.func @transform_7(%arg0: i32, %arg1: i32, %arg2: i32) -> (i32, i32, i32, i32) {
    %c0_i32 = arith.constant 0 : i32
    %c0_i32_0 = arith.constant 0 : i32
    %c0_i32_1 = arith.constant 0 : i32
    return %arg0, %arg1, %c0_i32, %c0_i32_0 : i32, i32, i32, i32
  }
}

module attributes {stable_mosaic.version = 11 : i64} {
  func.func @psp_pool_kernel(%arg0: i32, %arg1: i32, %arg2: i32, %arg3: memref<1x256x128xbf16, #tpu.memory_space<vmem>>, %arg4: memref<128x256xbf16, #tpu.memory_space<vmem>>, %arg5: memref<128x128xbf16, #tpu.memory_space<vmem>>, %arg6: memref<1x128xf32, #tpu.memory_space<vmem>>, %arg7: memref<128x128xbf16, #tpu.memory_space<vmem>>, %arg8: memref<1x128xf32, #tpu.memory_space<vmem>>, %arg9: memref<1x1x128x128xf32, #tpu.memory_space<vmem>>, %arg10: memref<1x1x128x128xf32, #tpu.memory_space<vmem>>) attributes {dimension_semantics = [#tpu.dimension_semantics<parallel>, #tpu.dimension_semantics<parallel>, #tpu.dimension_semantics<arbitrary>], iteration_bounds = array<i64: 2, 1, 1>, scalar_prefetch = 0 : i64, scratch_operands = 0 : i64, tpu.core_type = #tpu.core_type<tc>, window_params = [{transform_indices = @transform_0, window_bounds = array<i64: 1, 256, 128>}, {transform_indices = @transform_1, window_bounds = array<i64: 128, 256>}, {pipeline_mode = #tpu.pipeline_mode<synchronous>, transform_indices = @transform_2, window_bounds = array<i64: 128, 128>}, {pipeline_mode = #tpu.pipeline_mode<synchronous>, transform_indices = @transform_3, window_bounds = array<i64: 1, 128>}, {pipeline_mode = #tpu.pipeline_mode<synchronous>, transform_indices = @transform_4, window_bounds = array<i64: 128, 128>}, {pipeline_mode = #tpu.pipeline_mode<synchronous>, transform_indices = @transform_5, window_bounds = array<i64: 1, 128>}, {transform_indices = @transform_6, window_bounds = array<i64: 1, 1, 128, 128>}, {transform_indices = @transform_7, window_bounds = array<i64: 1, 1, 128, 128>}]} {
    %c0_i32 = arith.constant 0 : i32
    %0 = arith.cmpi eq, %arg2, %c0_i32 : i32
    %1 = arith.extui %0 : i1 to i32
    %c0_i32_0 = arith.constant 0 : i32
    %2 = arith.cmpi ne, %1, %c0_i32_0 : i32
    scf.if %2 {
      %cst_33 = arith.constant 0.000000e+00 : f32
      %34 = vector.broadcast %cst_33 : f32 to vector<128x128xf32>
      %c0_34 = arith.constant 0 : index
      %c0_35 = arith.constant 0 : index
      %c0_36 = arith.constant 0 : index
      %c0_37 = arith.constant 0 : index
      %35 = vector.load %arg9[%c0_34, %c0_35, %c0_36, %c0_37] : memref<1x1x128x128xf32, #tpu.memory_space<vmem>>, vector<1x1x128x128xf32>
      %36 = vector.shape_cast %35 : vector<1x1x128x128xf32> to vector<128x128xf32>
      %37 = vector.shape_cast %34 : vector<128x128xf32> to vector<1x1x128x128xf32>
      tpu.vector_store %arg9[%c0_34, %c0_35, %c0_36, %c0_37], %37 {strides = array<i32>} : memref<1x1x128x128xf32, #tpu.memory_space<vmem>>, vector<1x1x128x128xf32>,
      %cst_38 = arith.constant 0.000000e+00 : f32
      %38 = vector.broadcast %cst_38 : f32 to vector<128x128xf32>
      %c0_39 = arith.constant 0 : index
      %c0_40 = arith.constant 0 : index
      %c0_41 = arith.constant 0 : index
      %c0_42 = arith.constant 0 : index
      %39 = vector.load %arg10[%c0_39, %c0_40, %c0_41, %c0_42] : memref<1x1x128x128xf32, #tpu.memory_space<vmem>>, vector<1x1x128x128xf32>
      %40 = vector.shape_cast %39 : vector<1x1x128x128xf32> to vector<128x128xf32>
      %41 = vector.shape_cast %38 : vector<128x128xf32> to vector<1x1x128x128xf32>
      tpu.vector_store %arg10[%c0_39, %c0_40, %c0_41, %c0_42], %41 {strides = array<i32>} : memref<1x1x128x128xf32, #tpu.memory_space<vmem>>, vector<1x1x128x128xf32>,
    } else {
    }
    %c0 = arith.constant 0 : index
    %c0_1 = arith.constant 0 : index
    %c0_2 = arith.constant 0 : index
    %3 = vector.load %arg3[%c0, %c0_1, %c0_2] : memref<1x256x128xbf16, #tpu.memory_space<vmem>>, vector<1x256x128xbf16>
    %4 = vector.shape_cast %3 : vector<1x256x128xbf16> to vector<256x128xbf16>
    %c0_3 = arith.constant 0 : index
    %c0_4 = arith.constant 0 : index
    %5 = vector.load %arg5[%c0_3, %c0_4] : memref<128x128xbf16, #tpu.memory_space<vmem>>, vector<128x128xbf16>
    %cst = arith.constant dense<0.000000e+00> : vector<256x128xf32>
    %6 = tpu.matmul %4, %5, %cst {dimension_numbers = #tpu.dot_dimension_numbers<[1], [0], [0], [1], [0, 0, 1, 1], [], []>} : vector<256x128xbf16>, vector<128x128xbf16>, vector<256x128xf32> -> vector<256x128xf32>
    %c0_5 = arith.constant 0 : index
    %c0_6 = arith.constant 0 : index
    %7 = vector.load %arg6[%c0_5, %c0_6] : memref<1x128xf32, #tpu.memory_space<vmem>>, vector<1x128xf32>
    %8 = vector.broadcast %7 : vector<1x128xf32> to vector<256x128xf32>
    %9 = arith.addf %6, %8 : vector<256x128xf32>
    %cst_7 = arith.constant 0.000000e+00 : f32
    %10 = vector.broadcast %cst_7 : f32 to vector<256x128xf32>
    %11 = arith.maximumf %9, %10 : vector<256x128xf32>
    %c0_8 = arith.constant 0 : index
    %c0_9 = arith.constant 0 : index
    %12 = vector.load %arg7[%c0_8, %c0_9] : memref<128x128xbf16, #tpu.memory_space<vmem>>, vector<128x128xbf16>
    %cst_10 = arith.constant dense<0.000000e+00> : vector<256x128xf32>
    %13 = tpu.matmul %4, %12, %cst_10 {dimension_numbers = #tpu.dot_dimension_numbers<[1], [0], [0], [1], [0, 0, 1, 1], [], []>} : vector<256x128xbf16>, vector<128x128xbf16>, vector<256x128xf32> -> vector<256x128xf32>
    %c0_11 = arith.constant 0 : index
    %c0_12 = arith.constant 0 : index
    %14 = vector.load %arg8[%c0_11, %c0_12] : memref<1x128xf32, #tpu.memory_space<vmem>>, vector<1x128xf32>
    %15 = vector.broadcast %14 : vector<1x128xf32> to vector<256x128xf32>
    %16 = arith.addf %13, %15 : vector<256x128xf32>
    %c0_13 = arith.constant 0 : index
    %c0_14 = arith.constant 0 : index
    %17 = vector.load %arg4[%c0_13, %c0_14] : memref<128x256xbf16, #tpu.memory_space<vmem>>, vector<128x256xbf16>
    %c0_15 = arith.constant 0 : index
    %c0_16 = arith.constant 0 : index
    %c0_17 = arith.constant 0 : index
    %c0_18 = arith.constant 0 : index
    %18 = vector.load %arg9[%c0_15, %c0_16, %c0_17, %c0_18] : memref<1x1x128x128xf32, #tpu.memory_space<vmem>>, vector<1x1x128x128xf32>
    %19 = vector.shape_cast %18 : vector<1x1x128x128xf32> to vector<128x128xf32>
    %20 = arith.truncf %11 : vector<256x128xf32> to vector<256x128xbf16>
    %cst_19 = arith.constant dense<0.000000e+00> : vector<128x128xf32>
    %21 = tpu.matmul %17, %20, %cst_19 {dimension_numbers = #tpu.dot_dimension_numbers<[1], [0], [0], [1], [0, 0, 1, 1], [], []>} : vector<128x256xbf16>, vector<256x128xbf16>, vector<128x128xf32> -> vector<128x128xf32>
    %22 = arith.addf %19, %21 : vector<128x128xf32>
    %c0_20 = arith.constant 0 : index
    %c0_21 = arith.constant 0 : index
    %c0_22 = arith.constant 0 : index
    %c0_23 = arith.constant 0 : index
    %23 = vector.load %arg9[%c0_20, %c0_21, %c0_22, %c0_23] : memref<1x1x128x128xf32, #tpu.memory_space<vmem>>, vector<1x1x128x128xf32>
    %24 = vector.shape_cast %23 : vector<1x1x128x128xf32> to vector<128x128xf32>
    %25 = vector.shape_cast %22 : vector<128x128xf32> to vector<1x1x128x128xf32>
    tpu.vector_store %arg9[%c0_20, %c0_21, %c0_22, %c0_23], %25 {strides = array<i32>} : memref<1x1x128x128xf32, #tpu.memory_space<vmem>>, vector<1x1x128x128xf32>,
    %c0_24 = arith.constant 0 : index
    %c0_25 = arith.constant 0 : index
    %c0_26 = arith.constant 0 : index
    %c0_27 = arith.constant 0 : index
    %26 = vector.load %arg10[%c0_24, %c0_25, %c0_26, %c0_27] : memref<1x1x128x128xf32, #tpu.memory_space<vmem>>, vector<1x1x128x128xf32>
    %27 = vector.shape_cast %26 : vector<1x1x128x128xf32> to vector<128x128xf32>
    %28 = arith.truncf %16 : vector<256x128xf32> to vector<256x128xbf16>
    %cst_28 = arith.constant dense<0.000000e+00> : vector<128x128xf32>
    %29 = tpu.matmul %17, %28, %cst_28 {dimension_numbers = #tpu.dot_dimension_numbers<[1], [0], [0], [1], [0, 0, 1, 1], [], []>} : vector<128x256xbf16>, vector<256x128xbf16>, vector<128x128xf32> -> vector<128x128xf32>
    %30 = arith.addf %27, %29 : vector<128x128xf32>
    %c0_29 = arith.constant 0 : index
    %c0_30 = arith.constant 0 : index
    %c0_31 = arith.constant 0 : index
    %c0_32 = arith.constant 0 : index
    %31 = vector.load %arg10[%c0_29, %c0_30, %c0_31, %c0_32] : memref<1x1x128x128xf32, #tpu.memory_space<vmem>>, vector<1x1x128x128xf32>
    %32 = vector.shape_cast %31 : vector<1x1x128x128xf32> to vector<128x128xf32>
    %33 = vector.shape_cast %30 : vector<128x128xf32> to vector<1x1x128x128xf32>
    tpu.vector_store %arg10[%c0_29, %c0_30, %c0_31, %c0_32], %33 {strides = array<i32>} : memref<1x1x128x128xf32, #tpu.memory_space<vmem>>, vector<1x1x128x128xf32>,
    return
  }
  func.func @transform_0(%arg0: i32, %arg1: i32, %arg2: i32) -> (i32, i32, i32) {
    %c1_i32 = arith.constant 1 : i32
    %0 = arith.muli %arg1, %c1_i32 : i32
    %1 = arith.addi %0, %arg2 : i32
    %c0_i32 = arith.constant 0 : i32
    %c0_i32_0 = arith.constant 0 : i32
    return %arg0, %1, %c0_i32 : i32, i32, i32
  }
  func.func @transform_1(%arg0: i32, %arg1: i32, %arg2: i32) -> (i32, i32) {
    %c1_i32 = arith.constant 1 : i32
    %0 = arith.muli %arg1, %c1_i32 : i32
    %1 = arith.addi %0, %arg2 : i32
    %c0_i32 = arith.constant 0 : i32
    %c0_i32_0 = arith.constant 0 : i32
    return %c0_i32, %1 : i32, i32
  }
  func.func @transform_2(%arg0: i32, %arg1: i32, %arg2: i32) -> (i32, i32) {
    %c0_i32 = arith.constant 0 : i32
    %c0_i32_0 = arith.constant 0 : i32
    %c0_i32_1 = arith.constant 0 : i32
    return %c0_i32, %c0_i32_0 : i32, i32
  }
  func.func @transform_3(%arg0: i32, %arg1: i32, %arg2: i32) -> (i32, i32) {
    %c0_i32 = arith.constant 0 : i32
    %c0_i32_0 = arith.constant 0 : i32
    %c0_i32_1 = arith.constant 0 : i32
    return %c0_i32, %c0_i32_0 : i32, i32
  }
  func.func @transform_4(%arg0: i32, %arg1: i32, %arg2: i32) -> (i32, i32) {
    %c0_i32 = arith.constant 0 : i32
    %c0_i32_0 = arith.constant 0 : i32
    %c0_i32_1 = arith.constant 0 : i32
    return %c0_i32, %c0_i32_0 : i32, i32
  }
  func.func @transform_5(%arg0: i32, %arg1: i32, %arg2: i32) -> (i32, i32) {
    %c0_i32 = arith.constant 0 : i32
    %c0_i32_0 = arith.constant 0 : i32
    %c0_i32_1 = arith.constant 0 : i32
    return %c0_i32, %c0_i32_0 : i32, i32
  }
  func.func @transform_6(%arg0: i32, %arg1: i32, %arg2: i32) -> (i32, i32, i32, i32) {
    %c0_i32 = arith.constant 0 : i32
    %c0_i32_0 = arith.constant 0 : i32
    %c0_i32_1 = arith.constant 0 : i32
    return %arg0, %arg1, %c0_i32, %c0_i32_0 : i32, i32, i32, i32
  }
  func.func @transform_7(%arg0: i32, %arg1: i32, %arg2: i32) -> (i32, i32, i32, i32) {
    %c0_i32 = arith.constant 0 : i32
    %c0_i32_0 = arith.constant 0 : i32
    %c0_i32_1 = arith.constant 0 : i32
    return %arg0, %arg1, %c0_i32, %c0_i32_0 : i32, i32, i32, i32
  }
}

</mosaic_0001>

<bundles_post_ra>
// kernel: tpu_custom_call.1
= control target key start
LH: loop header
LB: loop body
LE: loop exit
PB: predicated region body
PF: predicated region fallthrough
CT: control target
= control target key end

     0   :  { %s3032_s0 = inlined_call_operand.hbm [shape: bf16[2,256,128], index: 0, kind: input, shape index: {}]   ;;  %s3033_s1 = inlined_call_operand.hbm [shape: bf16[128,256], index: 1, kind: input, shape index: {}]   ;;  %s3034_s2 = inlined_call_operand.hbm [shape: bf16[128,128], index: 2, kind: input, shape index: {}]   ;;  %s3035_s3 = inlined_call_operand.vmem [shape: f32[1,128], index: 3, kind: input, shape index: {}]   ;;  %s3036_s4 = inlined_call_operand.hbm [shape: bf16[128,128], index: 4, kind: input, shape index: {}]   ;;  %s3037_s5 = inlined_call_operand.vmem [shape: f32[1,128], index: 5, kind: input, shape index: {}]   ;;  %s3038_s6 = inlined_call_operand.hbm [shape: f32[2,1,128,128], index: 6, kind: output, shape index: {0}]   ;;  %s3039_s7 = inlined_call_operand.hbm [shape: f32[2,1,128,128], index: 7, kind: output, shape index: {1}]  }
   0x1   :  { %3047 = sst [smem:[#allocation20_spill]] %s3033_s1 }
   0x2   :  { %3048 = sst [smem:[#allocation21_spill]] %s3038_s6 }
   0x3   :  { %13 = vsyncpa [#allocation3], 0 }
   0x4   :  { %15 = vsyncpa [#allocation3 + $0x1], 0 }
   0x5   :  { %16 = vsyncpa [#allocation6], 0 }
   0x6   :  { %17 = vsyncpa [#allocation9], 0 }
   0x7   :  { %18 = vsyncpa [#allocation4], 0 }
   0x8   :  { %20 = vsyncpa [#allocation4 + $0x1], 0 }
   0x9   :  { %21 = vsyncpa [#allocation12], 0 }
   0xa   :  { %23 = vsyncpa [#allocation12 + $0x1], 0  ;;  %s2474_s24 = smov 0   ;;  %s2476_s25 = smov 0  }
   0xb   :  { %s2478_s26 = smov 0   ;;  %s2480_s27 = smov 0  }
   0xc   :  { %s2482_s28 = smov 0   ;;  %s2484_s29 = smov 0  }
   0xd LB: > { %3049 = sst [smem:[#allocation18_spill]] %s2400_s24  ;;  %s1673_s30 = sadd.s32 4294967295, %s2420_s29   ;;  %s2420_s29 = sphi %s2484_s29, %s29_s29   ;;  %s2416_s28 = sphi %s2482_s28, %s3075_s28   ;;  %s2412_s27 = sphi %s2480_s27, %s3074_s27   ;;  %s2408_s26 = sphi %s2478_s26, %s3073_s26   ;;  %s2404_s25 = sphi %s2476_s25, %s3072_s25   ;;  %s2400_s24 = sphi %s2474_s24, %s3071_s24  }
   0xe   : > { %s1674_s8 = sadd.s32 4294967294, %s2420_s29   ;;  %p72_p0 = scmp.ne.s32.totalorder %s2404_s25, %s2400_s24 }
   0xf   : > { %p2508_p1 = scmp.eq.s32.totalorder %s1673_s30, 0  ;;  %p2512_p2 = scmp.eq.s32.totalorder %s1673_s30, 1 }
  0x10   : > { %p216_p3 = scmp.eq.s32.totalorder %s1674_s8, 1  ;;  %p1675_p5 = scmp.ge.s32.totalorder %s2420_s29, 1 }
  0x11   : > { %s3050_s9 = scalar_select %p2508_p1, 1, 0 }
  0x12   : > { %s3051_s10 = scalar_select %p2512_p2, 1, 0 }
  0x13   : > { %p2518_p4 = por %p2508_p1, %p72_p0  ;;  %p2523_p6 = por %p216_p3, %p72_p0 }
  0x14   : > { %p251_p7 = scmp.lt.s32.totalorder %s2420_s29, 3  ;;  %s2422_s14 = smov [#allocation5]  }
  0x15   : > { %s3052_s11 = scalar_select %p2518_p4, 1, 0 }
  0x16   : > { %s3053_s12 = scalar_select %p2523_p6, 1, 0 }
  0x17   : > { %p2528_p8 = pnand %p1675_p5, %p251_p7  ;;  %s267_s15 = sshll.u32 %s2422_s14, 4  ;;  %s2532_s15 = int_to_ptr.vmem [resolvable:$true] %s267_s15 }
  0x18   : > { %3054 = sst [smem:[#allocation19_spill]] %s3053_s12  ;;  %s2423_s17 = smov [#allocation7]  }
  0x19   : > { %s3055_s13 = scalar_select %p2528_p8, 1, 0 }
  0x1a   : > { %p2041_p9 = pneg %p2528_p8  ;;  %s280_s18 = sshll.u32 %s2423_s17, 4  ;;  %s2543_s18 = int_to_ptr.vmem [resolvable:$true] %s280_s18 }
  0x1b   : > { %s3057_s1 = sld [smem:[#allocation20_spill]] }
  0x1c   : > { %p2539_p11 = pnand %p2041_p9, %p2508_p1 }
  0x1e   : > { %p2553_p13 = pneg %p2539_p11 }
  0x21   : > { %s2184_s21 = scalar_lea.hbm %s3057_s1, 2048 }
  0x22   : > { %p2185_p12 = scmp.ne.s32.totalorder %s3057_s1, %s2184_s21  ;;  %p2191_p5 = scmp.lt.u32.totalorder %s2184_s21, %s3057_s1 }
  0x24   : > { %p2187_p0 = pnand %p2553_p13, %p2185_p12 }
  0x26   : > { %p2188_p3 = pneg %p2187_p0 }
  0x28   : > { %p2193_p7 = pnand %p2191_p5, %p2188_p3 }
  0x2a   : > { %2196 = shalt.err (!%p2193_p7)
}
  0x2b   : > { %s2197_s17 = scalar_lea.vmem %s2532_s15, 2048  ;;  %p2205_p1 = scmp.lt.s32.totalorder %s2532_s15, %s2532_s15 }
  0x2c   : > { %p2198_p9 = scmp.ne.s32.totalorder %s2532_s15, %s2197_s17  ;;  %p2206_p4 = scmp.lt.s32.totalorder %s2197_s17, %s2197_s17 }
  0x2e   : > { %p2200_p10 = pnand %p2198_p9, %p2553_p13  ;;  %p2207_p12 = por %p2206_p4, %p2205_p1 }
  0x30   : > { %p2201_p6 = pneg %p2200_p10 }
  0x32   : > { %p2208_p0 = pnand %p2207_p12, %p2201_p6 }
  0x34   : > { %2211 = shalt.err (!%p2208_p0)
}
  0x35   : > { %s2424_s19 = smov 128   ;;  %s2425_s20 = smov 8  }
  0x36   : > { %2044 = dma.hbm_to_vmem [thread:$0]  (!%p2539_p11), %s3057_s1, 2048, %s2532_s15, [#allocation6], %s2424_s19, %s2424_s19, %s2425_s20  }
  0x37   : > { %s2212_s14 = scalar_lea.hbm %s3034_s2, 1024 }
  0x38   : > { %p2213_p1 = scmp.ne.s32.totalorder %s3034_s2, %s2212_s14  ;;  %p2219_p10 = scmp.lt.u32.totalorder %s2212_s14, %s3034_s2 }
  0x3a   : > { %p2215_p4 = pnand %p2213_p1, %p2553_p13 }
  0x3c   : > { %p2216_p6 = pneg %p2215_p4 }
  0x3e   : > { %p2221_p3 = pnand %p2219_p10, %p2216_p6 }
  0x40   : > { %2224 = shalt.err (!%p2221_p3)
}
  0x41   : > { %s2225_s15 = scalar_lea.vmem %s2543_s18, 1024  ;;  %p2233_p12 = scmp.lt.s32.totalorder %s2543_s18, %s2543_s18 }
  0x42   : > { %p2226_p5 = scmp.ne.s32.totalorder %s2543_s18, %s2225_s15  ;;  %p2234_p0 = scmp.lt.s32.totalorder %s2225_s15, %s2225_s15 }
  0x44   : > { %p2228_p7 = pnand %p2226_p5, %p2553_p13  ;;  %p2235_p1 = por %p2234_p0, %p2233_p12 }
  0x46   : > { %p2229_p9 = pneg %p2228_p7 }
  0x48   : > { %p2236_p4 = pnand %p2235_p1, %p2229_p9 }
  0x4a   : > { %2239 = shalt.err (!%p2236_p4)
}
  0x4b   : > { %s2426_s24 = smov 64   ;;  %s2427_s6 = smov 4  }
  0x4c   : > { %2047 = dma.hbm_to_vmem [thread:$0]  (!%p2539_p11), %s3034_s2, 1024, %s2543_s18, [#allocation6], %s2426_s24, %s2426_s24, %s2427_s6  }
  0x4d   : > { %s2428_s20 = smov [#allocation8]   ;;  %s2240_s8 = scalar_lea.hbm %s3036_s4, 1024 }
  0x4e   : > { %s296_s21 = sshll.u32 %s2428_s20, 4  ;;  %p2241_p6 = scmp.ne.s32.totalorder %s3036_s4, %s2240_s8  ;;  %s297_s21 = int_to_ptr.vmem [resolvable:$true] %s296_s21 }
  0x4f   : > { %p2247_p5 = scmp.lt.u32.totalorder %s2240_s8, %s3036_s4 }
  0x50   : > { %p2243_p10 = pnand %p2241_p6, %p2553_p13 }
  0x52   : > { %p2244_p3 = pneg %p2243_p10 }
  0x54   : > { %p2249_p7 = pnand %p2247_p5, %p2244_p3 }
  0x56   : > { %2252 = shalt.err (!%p2249_p7)
}
  0x57   : > { %s2253_s18 = scalar_lea.vmem %s297_s21, 1024  ;;  %p2261_p1 = scmp.lt.s32.totalorder %s297_s21, %s297_s21 }
  0x58   : > { %p2254_p9 = scmp.ne.s32.totalorder %s297_s21, %s2253_s18  ;;  %p2262_p4 = scmp.lt.s32.totalorder %s2253_s18, %s2253_s18 }
  0x5a   : > { %p2256_p12 = pnand %p2254_p9, %p2553_p13  ;;  %p2263_p8 = por %p2262_p4, %p2261_p1 }
  0x5c   : > { %p2257_p0 = pneg %p2256_p12 }
  0x5e   : > { %p2264_p2 = pnand %p2263_p8, %p2257_p0 }
  0x60   : > { %2267 = shalt.err (!%p2264_p2)
}
  0x61   : > { %2050 = dma.hbm_to_vmem [thread:$0]  (!%p2539_p11), %s3036_s4, 1024, %s297_s21, [#allocation9], %s2426_s24, %s2426_s24, %s2427_s6  }
  0x62   : > { %s48_s30 = sadd.s32 1, %s2416_s28  ;;  %s59_s16 = sadd.s32 1, %s2408_s26 }
  0x63   : > { %p50_p2 = scmp.ge.s32.totalorder %s48_s30, 2  ;;  %p66_p8 = scmp.ne.s32.totalorder %s2408_s26, %s2404_s25 }
  0x64   : > { %p67_p13 = scmp.eq.s32.totalorder %s2420_s29, 0  ;;  %p3060_p10 = scmp.ne.s32.totalorder %s3051_s10, 0 }
  0x65   : > { %s3077_s30 = smov (%p50_p2, %s48_s30), 0  ;;  %p2065_p11 = scmp.lt.s32.totalorder %s2420_s29, 2 }
  0x66   : > { %p2628_p6 = por %p67_p13, %p66_p8  ;;  %p2634_p3 = por %p3060_p10, %p66_p8 }
  0x67   : > { %s54_s22 = ssub.s32 %s2416_s28, %s3077_s30  ;;  %s313_s21 = sand.u32 1, %s2408_s26  }
  0x68   : > { %p57_p5 = scmp.eq.s32.totalorder %s54_s22, 0  ;;  %s1680_s23 = sshll.u32 %s313_s21, 7 }
  0x69   : > { %s1748_s14 = sshll.u32 %s2416_s28, 11  ;;  %s317_s10 = scalar_lea.vmem [#allocation2], %s1680_s23 }
  0x6a   : > { %s2643_s8 = scalar_select %p57_p5, %s2408_s26, %s59_s16  }
  0x6b   : > { %s2649_s18 = scalar_lea.hbm %s3032_s0, %s1748_s14  ;;  %s327_s1 = sshll.u32 %s317_s10, 4  ;;  %s2651_s1 = int_to_ptr.vmem [resolvable:$true] %s327_s1 }
  0x6c   : > { %p2655_p7 = pnand %p2065_p11, %p2628_p6  ;;  %s2659_s16 = scalar_lea.sflag [#allocation3], %s313_s21 }
  0x6d   : > { %s2268_s22 = scalar_lea.hbm %s2649_s18, 2048  ;;  %s2273_s19 = scalar_lea.hbm %s3032_s0, 4096 }
  0x6e   : > { %p2269_p9 = scmp.ne.s32.totalorder %s2649_s18, %s2268_s22  ;;  %p2270_p12 = pneg %p2655_p7 }
  0x6f   : > { %p2274_p4 = scmp.lt.u32.totalorder %s2649_s18, %s3032_s0  ;;  %p2275_p2 = scmp.lt.u32.totalorder %s2273_s19, %s2268_s22 }
  0x70   : > { %p2271_p0 = pnand %p2270_p12, %p2269_p9  ;;  %p2277_p13 = scmp.lt.u32.totalorder %s2268_s22, %s2649_s18 }
  0x71   : > { %p2276_p8 = por %p2275_p2, %p2274_p4 }
  0x72   : > { %p2272_p1 = pneg %p2271_p0 }
  0x73   : > { %p2278_p6 = por %p2277_p13, %p2276_p8 }
  0x75   : > { %p2279_p10 = pnand %p2278_p6, %p2272_p1 }
  0x77   : > { %2282 = shalt.err (!%p2279_p10)
}
  0x78   : > { %s2283_s21 = scalar_lea.vmem %s2651_s1, 2048  ;;  %s2429_s10 = smov [#allocation2]  }
  0x79   : > { %p2284_p11 = scmp.ne.s32.totalorder %s2651_s1, %s2283_s21  ;;  %s2288_s23 = sshll.u32 %s2429_s10, 4  ;;  %s2289_s23 = int_to_ptr.vmem [resolvable:$false] %s2288_s23 }
  0x7a   : > { %s2290_s14 = scalar_lea.vmem %s2289_s23, 4096  ;;  %p2291_p0 = scmp.lt.s32.totalorder %s2651_s1, %s2289_s23 }
  0x7b   : > { %p2286_p5 = pnand %p2284_p11, %p2270_p12  ;;  %p2292_p4 = scmp.lt.s32.totalorder %s2290_s14, %s2283_s21 }
  0x7d   : > { %p2287_p9 = pneg %p2286_p5  ;;  %p2293_p2 = por %p2292_p4, %p2291_p0 }
  0x7f   : > { %p2294_p8 = pnand %p2293_p2, %p2287_p9 }
  0x81   : > { %2297 = shalt.err (!%p2294_p8)
}
  0x82   : > { %2054 = dma.hbm_to_vmem [thread:$0]  (!%p2655_p7), %s2649_s18, 2048, %s2651_s1, %s2659_s16, %s2426_s24, %s2426_s24, %s2427_s6  }
  0x83   : > { %p3063_p12 = scmp.ne.s32.totalorder %s3055_s13, 0 }
  0x84   : > { %s2693_s22 = sand.u32 (!%p3063_p12), 1, %s2404_s25   ;;  %p3064_p1 = scmp.ne.s32.totalorder (!%p3063_p12), %s3052_s11, 0 }
  0x85   : > { %339 = sbr.rel (%p3063_p12) target bundleno = 775 (0x307), region = 44  ;;  %s2696_s19 = sshll.u32 (!%p3063_p12), %s2693_s22, 7 }
  0x86   : > { %s342_s12 = scalar_lea.sflag (!%p3063_p12), [#allocation3], %s2693_s22  ;;  %s2700_s17 = scalar_lea.vmem (!%p3063_p12), [#allocation2], %s2696_s19 }
  0x8c   : > { %2379 = dma.done.wait (%p3064_p1), %s342_s12, 2048  }
  0x8d   : > { %2381 = vsyncadd (%p3064_p1), %s342_s12, 4294965248  ;;  %p3065_p7 = scmp.ne.s32.totalorder %s3050_s9, 0 }
  0x8f   : > { %2383 = dma.done.wait (%p3065_p7), [#allocation6], 3072  }
  0x90   : > { %2385 = vsyncadd (%p3065_p7), [#allocation6], 4294964224 }
  0x91   : > { %2387 = dma.done.wait (%p3065_p7), [#allocation9], 1024  }
  0x92   : > { %2389 = vsyncadd (%p3065_p7), [#allocation9], 4294966272  ;;  %v2128_v0 = vld [vmem:[#allocation7] sm:$0xff]   ;;  %v2130_v2 = vld [vmem:[#allocation7 + $0x8] sm:$0xff]   ;;  %s2901_s6 = scalar_lea.vmem [#allocation11], %s2696_s19  ;;  %s2905_s18 = scalar_lea.vmem [#allocation10], %s2696_s19 }
  0x93   : > { %v2129_v1 = vld [vmem:[#allocation8] sm:$0xff]   ;;  %1927 = vmatprep.subr.bf16.mxu0 %v2128_v0  ;;  %v2131_v3 = vld [vmem:[#allocation8 + $0x8] sm:$0xff]   ;;  %v2132_v4 = vld [vmem:[#allocation7 + $0x10] sm:$0xff]   ;;  %s1749_s1 = sshll.u32 %s2412_s27, 11  ;;  %s1515_s16 = sshll.u32 %s2901_s6, 4  ;;  %s2943_s16 = int_to_ptr.vmem [resolvable:$true] %s1515_s16 }
  0x94   : > { %1975 = vmatprep.subr.bf16.mxu1 %v2129_v1  ;;  %1928 = vmatpush3.bf16.msra.mxu0 %v2128_v0  ;;  %v2133_v5 = vld [vmem:[#allocation8 + $0x10] sm:$0xff]   ;;  %v2134_v6 = vld [vmem:[#allocation7 + $0x18] sm:$0xff]   ;;  %v2136_v8 = vld [vmem:[#allocation7 + $0x20] sm:$0xff]   ;;  %s1497_s15 = sshll.u32 %s2905_s18, 4  ;;  %s2941_s23 = scalar_lea.hbm %s3039_s7, %s1749_s1  ;;  %s2951_s15 = int_to_ptr.vmem [resolvable:$true] %s1497_s15 }
  0x95   : > { %1976 = vmatpush3.bf16.msra.mxu1 %v2129_v1  ;;  %1929 = vmatprep.subr.bf16.mxu0 %v2130_v2  ;;  %v2135_v7 = vld [vmem:[#allocation8 + $0x18] sm:$0xff]   ;;  %v2137_v9 = vld [vmem:[#allocation8 + $0x20] sm:$0xff]   ;;  %v2138_v10 = vld [vmem:[#allocation7 + $0x28] sm:$0xff]   ;;  %s3066_s19 = sld [smem:[#allocation21_spill]]  ;;  %s2298_s9 = scalar_lea.vmem %s2943_s16, 2048 }
  0x96   : > { %1977 = vmatprep.subr.bf16.mxu1 %v2131_v3  ;;  %v2144_v11 = vld [vmem:[%s2700_s17] sm:$0xff]   ;;  %v2139_v12 = vld [vmem:[#allocation8 + $0x28] sm:$0xff]   ;;  %v2140_v13 = vld [vmem:[#allocation7 + $0x30] sm:$0xff]   ;;  %p2299_p13 = scmp.ne.s32.totalorder %s2943_s16, %s2298_s9  ;;  %s2430_s11 = smov [#allocation11]  }
  0x97   : > { %1943 = vmatprep.mubr.bf16.mxu0 %v2144_v11  ;;  %1991 = vmatprep.mubr.bf16.mxu1 %v2144_v11  ;;  %v2141_v14 = vld [vmem:[#allocation8 + $0x30] sm:$0xff]   ;;  %v2142_v15 = vld [vmem:[#allocation7 + $0x38] sm:$0xff]   ;;  %v2145_v17 = vld [vmem:[%s2700_s17 + $0x8] sm:$0xff]   ;;  %s2302_s13 = sshll.u32 %s2430_s11, 4  ;;  %s2303_s13 = int_to_ptr.vmem [resolvable:$false] %s2302_s13 }
  0x98   : > { %1930 = vmatpush3.bf16.msra.mxu0 %v2130_v2  ;;  %v2143_v16 = vld [vmem:[#allocation8 + $0x38] sm:$0xff]   ;;  %v2146_v18 = vld [vmem:[%s2700_s17 + $0x10] sm:$0xff]   ;;  %v2148_v20 = vld [vmem:[%s2700_s17 + $0x20] sm:$0xff]   ;;  %p2300_p6 = pnand %p2299_p13, %p2634_p3  ;;  %s2304_s24 = scalar_lea.vmem %s2303_s13, 4096 }
  0x99   : > { %1978 = vmatpush3.bf16.msra.mxu1 %v2131_v3  ;;  %1931 = vmatprep.subr.bf16.mxu0 %v2132_v4  ;;  %v2147_v19 = vld [vmem:[%s2700_s17 + $0x18] sm:$0xff]   ;;  %v2149_v21 = vld [vmem:[%s2700_s17 + $0x28] sm:$0xff]   ;;  %v2150_v22 = vld [vmem:[%s2700_s17 + $0x30] sm:$0xff]   ;;  %p2305_p11 = scmp.lt.s32.totalorder %s2943_s16, %s2303_s13  ;;  %p2306_p5 = scmp.lt.s32.totalorder %s2304_s24, %s2298_s9 }
  0x9a   : > { %1979 = vmatprep.subr.bf16.mxu1 %v2133_v5  ;;  %v2151_v23 = vld [vmem:[%s2700_s17 + $0x38] sm:$0xff]   ;;  %v2152_v24 = vld [vmem:[%s2700_s17 + $0x40] sm:$0xff]   ;;  %v2153_v25 = vld [vmem:[%s2700_s17 + $0x48] sm:$0xff]   ;;  %p2301_p10 = pneg %p2300_p6 }
  0x9b   : > { %v2154_v26 = vld [vmem:[%s2700_s17 + $0x50] sm:$0xff]   ;;  %v2155_v27 = vld [vmem:[%s2700_s17 + $0x58] sm:$0xff]   ;;  %v2156_v28 = vld [vmem:[%s2700_s17 + $0x60] sm:$0xff]   ;;  %s2949_s12 = scalar_lea.hbm %s3066_s19, %s1749_s1  ;;  %p2307_p9 = por %p2306_p5, %p2305_p11 }
  0x9c   : > { %1932 = vmatpush3.bf16.msra.mxu0 %v2132_v4  ;;  %v2157_v29 = vld [vmem:[%s2700_s17 + $0x68] sm:$0xff]   ;;  %v2158_v30 = vld [vmem:[%s2700_s17 + $0x70] sm:$0xff]   ;;  %v2159_v31 = vld [vmem:[%s2700_s17 + $0x78] sm:$0xff]   ;;  %s1482_s17 = scalar_lea.sflag [#allocation12], %s2693_s22 }
  0x9d   : > { %1980 = vmatpush3.bf16.msra.mxu1 %v2133_v5  ;;  %1933 = vmatprep.subr.bf16.mxu0 %v2134_v6  ;;  %v2162_v32 = vld [vmem:[#allocation5 + $0x4] ss:$8 sps:$4 sm:$0xff]   ;;  %v2733_v33 = vld [vmem:[%s3035_s3] ss:$0 sm:$0xff]  ;;  %p2308_p0 = pnand %p2307_p9, %p2301_p10 }
  0x9e   : > { %1981 = vmatprep.subr.bf16.mxu1 %v2135_v7  ;;  %v2738_v34 = vld [vmem:[%s3037_s5] ss:$0 sm:$0xff] }
  0xa0   : > { %1934 = vmatpush3.bf16.msra.mxu0 %v2134_v6 }
  0xa1   : > { %1982 = vmatpush3.bf16.msra.mxu1 %v2135_v7  ;;  %1935 = vmatprep.subr.bf16.mxu0 %v2136_v8 }
  0xa2   : > { %1983 = vmatprep.subr.bf16.mxu1 %v2137_v9 }
  0xa4   : > { %1936 = vmatpush3.bf16.msra.mxu0 %v2136_v8 }
  0xa5   : > { %1984 = vmatpush3.bf16.msra.mxu1 %v2137_v9  ;;  %1937 = vmatprep.subr.bf16.mxu0 %v2138_v10 }
  0xa6   : > { %1985 = vmatprep.subr.bf16.mxu1 %v2139_v12 }
  0xa8   : > { %1938 = vmatpush3.bf16.msra.mxu0 %v2138_v10 }
  0xa9   : > { %1986 = vmatpush3.bf16.msra.mxu1 %v2139_v12  ;;  %1939 = vmatprep.subr.bf16.mxu0 %v2140_v13 }
  0xaa   : > { %1987 = vmatprep.subr.bf16.mxu1 %v2141_v14 }
  0xac   : > { %1940 = vmatpush3.bf16.msra.mxu0 %v2140_v13 }
  0xad   : > { %1988 = vmatpush3.bf16.msra.mxu1 %v2141_v14  ;;  %1941 = vmatprep.subr.bf16.mxu0 %v2142_v15 }
  0xae   : > { %1989 = vmatprep.subr.bf16.mxu1 %v2143_v16 }
  0xb0   : > { %1942 = vmatpush3.bf16.msra.mxu0 %v2142_v15 }
  0xb1   : > { %1990 = vmatpush3.bf16.msra.mxu1 %v2143_v16 }
  0xb3   : > { %1944 = vmatmul.mubr.bf16.vlgmr.msra.gmra.mrb[0].mxu0 %v2145_v17 }
  0xb4   : > { %1992 = vmatmul.mubr.bf16.vlgmr.msra.gmra.mrb[0].mxu1 %v2145_v17  ;;  %1947 = vmatprep.mubr.bf16.mxu0 %v2146_v18 }
  0xb5   : > { %1995 = vmatprep.mubr.bf16.mxu1 %v2146_v18 }
  0xbb   : > { %1948 = vmatmul.mubr.bf16.gmra.mrb[4].mxu0 %v2147_v19 }
  0xbc   : > { %1996 = vmatmul.mubr.bf16.gmra.mrb[4].mxu1 %v2147_v19  ;;  %1951 = vmatprep.mubr.bf16.mxu0 %v2148_v20 }
  0xbd   : > { %1999 = vmatprep.mubr.bf16.mxu1 %v2148_v20 }
  0xc3   : > { %1952 = vmatmul.mubr.bf16.gmra.mrb[8].mxu0 %v2149_v21 }
  0xc4   : > { %2000 = vmatmul.mubr.bf16.gmra.mrb[8].mxu1 %v2149_v21  ;;  %1955 = vmatprep.mubr.bf16.mxu0 %v2150_v22 }
  0xc5   : > { %2003 = vmatprep.mubr.bf16.mxu1 %v2150_v22 }
  0xcb   : > { %1956 = vmatmul.mubr.bf16.gmra.mrb[12].mxu0 %v2151_v23 }
  0xcc   : > { %2004 = vmatmul.mubr.bf16.gmra.mrb[12].mxu1 %v2151_v23  ;;  %1959 = vmatprep.mubr.bf16.mxu0 %v2152_v24 }
  0xcd   : > { %2007 = vmatprep.mubr.bf16.mxu1 %v2152_v24 }
  0xd3   : > { %1960 = vmatmul.mubr.bf16.gmra.mrb[16].mxu0 %v2153_v25 }
  0xd4   : > { %2008 = vmatmul.mubr.bf16.gmra.mrb[16].mxu1 %v2153_v25  ;;  %1963 = vmatprep.mubr.bf16.mxu0 %v2154_v26 }
  0xd5   : > { %2011 = vmatprep.mubr.bf16.mxu1 %v2154_v26 }
  0xdb   : > { %1964 = vmatmul.mubr.bf16.gmra.mrb[20].mxu0 %v2155_v27 }
  0xdc   : > { %2012 = vmatmul.mubr.bf16.gmra.mrb[20].mxu1 %v2155_v27  ;;  %1967 = vmatprep.mubr.bf16.mxu0 %v2156_v28 }
  0xdd   : > { %2015 = vmatprep.mubr.bf16.mxu1 %v2156_v28 }
  0xe3   : > { %1968 = vmatmul.mubr.bf16.gmra.mrb[24].mxu0 %v2157_v29 }
  0xe4   : > { %2016 = vmatmul.mubr.bf16.gmra.mrb[24].mxu1 %v2157_v29  ;;  %1971 = vmatprep.mubr.bf16.mxu0 %v2158_v30 }
  0xe5   : > { %2019 = vmatprep.mubr.bf16.mxu1 %v2158_v30 }
  0xeb   : > { %1972 = vmatmul.mubr.bf16.gmra.mrb[28].mxu0 %v2159_v31 }
  0xec   : > { %2020 = vmatmul.mubr.bf16.gmra.mrb[28].mxu1 %v2159_v31  ;;  %1218 = vmatprep.mubr.bf16.mxu0 %v2162_v32 }
  0xed   : > { %1379 = vmatprep.mubr.bf16.mxu1 %v2162_v32 }
 0x186   : > { %v1945_v35 = vpop.f32.mrb[0].mxu0 }
 0x187   : > { %v676_v36 = vadd.f32 %v1945_v35, %v2733_v33  ;;  %v1993_v37 = vpop.f32.mrb[0].mxu1  ;;  %v667_v38 = vpop.f32.mrb[1].mxu0 }
 0x188   : > { %v2742_v39 = vadd.f32 %v1993_v37, %v2738_v34  ;;  %v668_v40 = vadd.f32 %v2733_v33, %v667_v38  ;;  %v931_v41 = vpop.f32.mrb[1].mxu1  ;;  %v1946_v42 = vpop.f32.mrb[2].mxu0 }
 0x189   : > { %v2746_v43 = vadd.f32 %v2738_v34, %v931_v41  ;;  %v679_v44 = vadd.f32 %v1946_v42, %v2733_v33  ;;  %v1994_v45 = vpop.f32.mrb[2].mxu1  ;;  %v670_v46 = vpop.f32.mrb[3].mxu0  ;;  %v796_v50 = vmax.f32 %v676_v36, 0.0 }
 0x18a   : > { %v2750_v47 = vadd.f32 %v1994_v45, %v2738_v34  ;;  %v671_v48 = vadd.f32 %v2733_v33, %v670_v46  ;;  %v934_v49 = vpop.f32.mrb[3].mxu1  ;;  %v794_v53 = vmax.f32 %v668_v40, 0.0 }
 0x18b   : > { %v797_v51 = vmax.f32 %v679_v44, 0.0  ;;  %v2754_v52 = vadd.f32 %v2738_v34, %v934_v49 }
 0x18c   : > { %v1332_v54 = vpack.c.bf16 %v2750_v47, %v2742_v39  ;;  %v795_v55 = vmax.f32 %v671_v48, 0.0 }
 0x18d   : > { %v2758_v56 = vpack.c.bf16 %v797_v51, %v796_v50  ;;  %v1331_v57 = vpack.c.bf16 %v2754_v52, %v2746_v43 }
 0x18e   : > { %v2762_v58 = vpack.c.bf16 %v795_v55, %v794_v53  ;;  %v1949_v59 = vpop.f32.mrb[4].mxu0 }
 0x18f   : > { %v692_v60 = vadd.f32 %v1949_v59, %v2733_v33  ;;  %v1997_v61 = vpop.f32.mrb[4].mxu1  ;;  %v683_v62 = vpop.f32.mrb[5].mxu0 }
 0x190   : > { %v2766_v63 = vadd.f32 %v1997_v61, %v2738_v34  ;;  %v684_v0 = vadd.f32 %v2733_v33, %v683_v62  ;;  %v947_v1 = vpop.f32.mrb[5].mxu1  ;;  %v1950_v2 = vpop.f32.mrb[6].mxu0 }
 0x191   : > { %v2770_v3 = vadd.f32 %v2738_v34, %v947_v1  ;;  %v695_v4 = vadd.f32 %v1950_v2, %v2733_v33  ;;  %v1998_v5 = vpop.f32.mrb[6].mxu1  ;;  %v686_v6 = vpop.f32.mrb[7].mxu0  ;;  %v800_v10 = vmax.f32 %v692_v60, 0.0 }
 0x192   : > { %v2774_v7 = vadd.f32 %v1998_v5, %v2738_v34  ;;  %v687_v8 = vadd.f32 %v2733_v33, %v686_v6  ;;  %v950_v9 = vpop.f32.mrb[7].mxu1  ;;  %v798_v13 = vmax.f32 %v684_v0, 0.0 }
 0x193   : > { %v801_v11 = vmax.f32 %v695_v4, 0.0  ;;  %v2778_v12 = vadd.f32 %v2738_v34, %v950_v9 }
 0x194   : > { %v1334_v14 = vpack.c.bf16 %v2774_v7, %v2766_v63  ;;  %v799_v15 = vmax.f32 %v687_v8, 0.0 }
 0x195   : > { %v2782_v16 = vpack.c.bf16 %v801_v11, %v800_v10  ;;  %v1333_v17 = vpack.c.bf16 %v2778_v12, %v2770_v3 }
 0x196   : > { %v2786_v18 = vpack.c.bf16 %v799_v15, %v798_v13  ;;  %v1953_v19 = vpop.f32.mrb[8].mxu0 }
 0x197   : > { %v708_v20 = vadd.f32 %v1953_v19, %v2733_v33  ;;  %v2001_v21 = vpop.f32.mrb[8].mxu1  ;;  %v699_v22 = vpop.f32.mrb[9].mxu0 }
 0x198   : > { %v2790_v23 = vadd.f32 %v2001_v21, %v2738_v34  ;;  %v700_v24 = vadd.f32 %v2733_v33, %v699_v22  ;;  %v963_v25 = vpop.f32.mrb[9].mxu1  ;;  %v1954_v26 = vpop.f32.mrb[10].mxu0 }
 0x199   : > { %v2794_v27 = vadd.f32 %v2738_v34, %v963_v25  ;;  %v711_v28 = vadd.f32 %v1954_v26, %v2733_v33  ;;  %v2002_v29 = vpop.f32.mrb[10].mxu1  ;;  %v702_v30 = vpop.f32.mrb[11].mxu0  ;;  %v804_v36 = vmax.f32 %v708_v20, 0.0 }
 0x19a   : > { %v2798_v31 = vadd.f32 %v2002_v29, %v2738_v34  ;;  %v703_v32 = vadd.f32 %v2733_v33, %v702_v30  ;;  %v966_v35 = vpop.f32.mrb[11].mxu1  ;;  %v802_v40 = vmax.f32 %v700_v24, 0.0 }
 0x19b   : > { %v805_v37 = vmax.f32 %v711_v28, 0.0  ;;  %v2802_v38 = vadd.f32 %v2738_v34, %v966_v35 }
 0x19c   : > { %v1336_v41 = vpack.c.bf16 %v2798_v31, %v2790_v23  ;;  %v803_v42 = vmax.f32 %v703_v32, 0.0  ;;  %v2165_v23 = vld [vmem:[#allocation5 + $0x10] ss:$8 sps:$4 sm:$0xff]   ;;  %v2166_v31 = vld [vmem:[#allocation5 + $0x24] ss:$8 sps:$4 sm:$0xff]  }
 0x19d   : > { %v2806_v44 = vpack.c.bf16 %v805_v37, %v804_v36  ;;  %v1335_v45 = vpack.c.bf16 %v2802_v38, %v2794_v27 }
 0x19e   : > { %v2810_v46 = vpack.c.bf16 %v803_v42, %v802_v40  ;;  %v1957_v48 = vpop.f32.mrb[12].mxu0 }
 0x19f   : > { %v724_v49 = vadd.f32 %v1957_v48, %v2733_v33  ;;  %v2005_v50 = vpop.f32.mrb[12].mxu1  ;;  %v715_v51 = vpop.f32.mrb[13].mxu0 }
 0x1a0   : > { %v2814_v53 = vadd.f32 %v2005_v50, %v2738_v34  ;;  %v716_v55 = vadd.f32 %v2733_v33, %v715_v51  ;;  %v979_v59 = vpop.f32.mrb[13].mxu1  ;;  %v1958_v60 = vpop.f32.mrb[14].mxu0 }
 0x1a1   : > { %v2818_v61 = vadd.f32 %v2738_v34, %v979_v59  ;;  %v727_v62 = vadd.f32 %v1958_v60, %v2733_v33  ;;  %v2006_v0 = vpop.f32.mrb[14].mxu1  ;;  %v718_v1 = vpop.f32.mrb[15].mxu0  ;;  %v808_v6 = vmax.f32 %v724_v49, 0.0 }
 0x1a2   : > { %v2822_v2 = vadd.f32 %v2006_v0, %v2738_v34  ;;  %v719_v4 = vadd.f32 %v2733_v33, %v718_v1  ;;  %v982_v5 = vpop.f32.mrb[15].mxu1  ;;  %v806_v10 = vmax.f32 %v716_v55, 0.0 }
 0x1a3   : > { %v809_v8 = vmax.f32 %v727_v62, 0.0  ;;  %v2826_v9 = vadd.f32 %v2738_v34, %v982_v5 }
 0x1a4   : > { %v1338_v11 = vpack.c.bf16 %v2822_v2, %v2814_v53  ;;  %v807_v13 = vmax.f32 %v719_v4, 0.0  ;;  %v2171_v53 = vld [vmem:[#allocation5 + $0x30] ss:$8 sps:$4 sm:$0xff]   ;;  %v2174_v2 = vld [vmem:[#allocation5 + $0x40] ss:$8 sps:$4 sm:$0xff]  }
 0x1a5   : > { %v2830_v15 = vpack.c.bf16 %v809_v8, %v808_v6  ;;  %v1337_v19 = vpack.c.bf16 %v2826_v9, %v2818_v61  ;;  %v2172_v61 = vld [vmem:[#allocation5 + $0x44] ss:$8 sps:$4 sm:$0xff]   ;;  %v2175_v9 = vld [vmem:[#allocation5 + $0x54] ss:$8 sps:$4 sm:$0xff]  }
 0x1a6   : > { %v2834_v20 = vpack.c.bf16 %v807_v13, %v806_v10  ;;  %v1961_v21 = vpop.f32.mrb[16].mxu0 }
 0x1a7   : > { %v740_v22 = vadd.f32 %v1961_v21, %v2733_v33  ;;  %v2009_v24 = vpop.f32.mrb[16].mxu1  ;;  %v731_v25 = vpop.f32.mrb[17].mxu0 }
 0x1a8   : > { %v1004_v26 = vadd.f32 %v2009_v24, %v2738_v34  ;;  %v732_v28 = vadd.f32 %v2733_v33, %v731_v25  ;;  %v995_v29 = vpop.f32.mrb[17].mxu1  ;;  %v1962_v30 = vpop.f32.mrb[18].mxu0 }
 0x1a9   : > { %v996_v32 = vadd.f32 %v2738_v34, %v995_v29  ;;  %v743_v35 = vadd.f32 %v1962_v30, %v2733_v33  ;;  %v2010_v36 = vpop.f32.mrb[18].mxu1  ;;  %v734_v37 = vpop.f32.mrb[19].mxu0  ;;  %v812_v49 = vmax.f32 %v740_v22, 0.0 }
 0x1aa   : > { %v1007_v40 = vadd.f32 %v2010_v36, %v2738_v34  ;;  %v735_v42 = vadd.f32 %v2733_v33, %v734_v37  ;;  %v998_v48 = vpop.f32.mrb[19].mxu1  ;;  %v810_v55 = vmax.f32 %v732_v28, 0.0 }
 0x1ab   : > { %v813_v50 = vmax.f32 %v743_v35, 0.0  ;;  %v999_v51 = vadd.f32 %v2738_v34, %v998_v48 }
 0x1ac   : > { %v1340_v59 = vpack.c.bf16 %v1007_v40, %v1004_v26  ;;  %v811_v60 = vmax.f32 %v735_v42, 0.0 }
 0x1ad   : > { %v1099_v62 = vpack.c.bf16 %v813_v50, %v812_v49  ;;  %v1339_v0 = vpack.c.bf16 %v999_v51, %v996_v32 }
 0x1ae   : > { %v1098_v1 = vpack.c.bf16 %v811_v60, %v810_v55  ;;  %v1965_v4 = vpop.f32.mrb[20].mxu0 }
 0x1af   : > { %v756_v5 = vadd.f32 %v1965_v4, %v2733_v33  ;;  %v2013_v6 = vpop.f32.mrb[20].mxu1  ;;  %1863 = vmatprep.subr.bf16.mxu1 %v1339_v0  ;;  %v747_v8 = vpop.f32.mrb[21].mxu0 }
 0x1b0   : > { %v1020_v10 = vadd.f32 %v2013_v6, %v2738_v34  ;;  %v748_v13 = vadd.f32 %v2733_v33, %v747_v8  ;;  %v1011_v21 = vpop.f32.mrb[21].mxu1  ;;  %1864 = vmatpush3.bf16.msra.mxu1 %v1331_v57  ;;  %v1966_v22 = vpop.f32.mrb[22].mxu0  ;;  %1799 = vmatprep.subr.bf16.mxu0 %v1098_v1 }
 0x1b1   : > { %v1012_v24 = vadd.f32 %v2738_v34, %v1011_v21  ;;  %v759_v25 = vadd.f32 %v1966_v22, %v2733_v33  ;;  %v2014_v26 = vpop.f32.mrb[22].mxu1  ;;  %1865 = vmatprep.subr.bf16.mxu1 %v1340_v59  ;;  %v750_v28 = vpop.f32.mrb[23].mxu0  ;;  %1800 = vmatpush3.bf16.msra.mxu0 %v2762_v58  ;;  %v816_v35 = vmax.f32 %v756_v5, 0.0 }
 0x1b2   : > { %v1023_v29 = vadd.f32 %v2014_v26, %v2738_v34  ;;  %v751_v30 = vadd.f32 %v2733_v33, %v750_v28  ;;  %v1014_v32 = vpop.f32.mrb[23].mxu1  ;;  %1801 = vmatprep.subr.bf16.mxu0 %v1099_v62  ;;  %v814_v57 = vmax.f32 %v748_v13, 0.0 }
 0x1b3   : > { %v817_v43 = vmax.f32 %v759_v25, 0.0  ;;  %v1015_v52 = vadd.f32 %v2738_v34, %v1014_v32 }
 0x1b4   : > { %v1342_v36 = vpack.c.bf16 %v1023_v29, %v1020_v10  ;;  %v815_v37 = vmax.f32 %v751_v30, 0.0  ;;  %1866 = vmatpush3.bf16.msra.mxu1 %v1332_v54 }
 0x1b5   : > { %v1101_v40 = vpack.c.bf16 %v817_v43, %v816_v35  ;;  %v1341_v42 = vpack.c.bf16 %v1015_v52, %v1012_v24  ;;  %1802 = vmatpush3.bf16.msra.mxu0 %v2758_v56 }
 0x1b6   : > { %v1100_v58 = vpack.c.bf16 %v815_v37, %v814_v57  ;;  %v1969_v48 = vpop.f32.mrb[24].mxu0 }
 0x1b7   : > { %v772_v49 = vadd.f32 %v1969_v48, %v2733_v33  ;;  %v2017_v50 = vpop.f32.mrb[24].mxu1  ;;  %1867 = vmatprep.subr.bf16.mxu1 %v1341_v42  ;;  %v763_v51 = vpop.f32.mrb[25].mxu0  ;;  %v2183_v42 = vld [vmem:[#allocation5 + $0x70] ss:$8 sps:$4 sm:$0xff]  }
 0x1b8   : > { %v1036_v55 = vadd.f32 %v2017_v50, %v2738_v34  ;;  %v764_v59 = vadd.f32 %v2733_v33, %v763_v51  ;;  %v1027_v60 = vpop.f32.mrb[25].mxu1  ;;  %1868 = vmatpush3.bf16.msra.mxu1 %v1333_v17  ;;  %v1970_v39 = vpop.f32.mrb[26].mxu0  ;;  %1803 = vmatprep.subr.bf16.mxu0 %v1100_v58 }
 0x1b9   : > { %v1028_v47 = vadd.f32 %v2738_v34, %v1027_v60  ;;  %v775_v54 = vadd.f32 %v1970_v39, %v2733_v33  ;;  %v2018_v56 = vpop.f32.mrb[26].mxu1  ;;  %v766_v62 = vpop.f32.mrb[27].mxu0  ;;  %1804 = vmatpush3.bf16.msra.mxu0 %v2786_v18  ;;  %1869 = vmatprep.subr.bf16.mxu1 %v1342_v36  ;;  %v820_v5 = vmax.f32 %v772_v49, 0.0 }
 0x1ba   : > { %v1039_v0 = vadd.f32 %v2018_v56, %v2738_v34  ;;  %v767_v1 = vadd.f32 %v2733_v33, %v766_v62  ;;  %v1030_v4 = vpop.f32.mrb[27].mxu1  ;;  %1805 = vmatprep.subr.bf16.mxu0 %v1101_v40  ;;  %v818_v17 = vmax.f32 %v764_v59, 0.0 }
 0x1bb   : > { %v821_v3 = vmax.f32 %v775_v54, 0.0  ;;  %v1031_v12 = vadd.f32 %v2738_v34, %v1030_v4 }
 0x1bc   : > { %v1344_v6 = vpack.c.bf16 %v1039_v0, %v1036_v55  ;;  %v819_v8 = vmax.f32 %v767_v1, 0.0  ;;  %1870 = vmatpush3.bf16.msra.mxu1 %v1334_v14 }
 0x1bd   : > { %v1103_v10 = vpack.c.bf16 %v821_v3, %v820_v5  ;;  %v1343_v18 = vpack.c.bf16 %v1031_v12, %v1028_v47  ;;  %1806 = vmatpush3.bf16.msra.mxu0 %v2782_v16 }
 0x1be   : > { %v1102_v13 = vpack.c.bf16 %v819_v8, %v818_v17  ;;  %v1973_v21 = vpop.f32.mrb[28].mxu0 }
 0x1bf   : > { %v788_v22 = vadd.f32 %v1973_v21, %v2733_v33  ;;  %v2021_v24 = vpop.f32.mrb[28].mxu1  ;;  %1871 = vmatprep.subr.bf16.mxu1 %v1343_v18  ;;  %v779_v25 = vpop.f32.mrb[29].mxu0 }
 0x1c0   : > { %v1052_v26 = vadd.f32 %v2021_v24, %v2738_v34  ;;  %v780_v28 = vadd.f32 %v2733_v33, %v779_v25  ;;  %v1043_v29 = vpop.f32.mrb[29].mxu1  ;;  %1872 = vmatpush3.bf16.msra.mxu1 %v1335_v45  ;;  %v1974_v63 = vpop.f32.mrb[30].mxu0  ;;  %1807 = vmatprep.subr.bf16.mxu0 %v1102_v13 }
 0x1c1   : > { %v1044_v7 = vadd.f32 %v2738_v34, %v1043_v29  ;;  %v791_v14 = vadd.f32 %v1974_v63, %v2733_v33  ;;  %v2022_v16 = vpop.f32.mrb[30].mxu1  ;;  %v782_v30 = vpop.f32.mrb[31].mxu0  ;;  %1808 = vmatpush3.bf16.msra.mxu0 %v2810_v46  ;;  %1873 = vmatprep.subr.bf16.mxu1 %v1344_v6  ;;  %v824_v52 = vmax.f32 %v788_v22, 0.0 }
 0x1c2   : > { %v1055_v32 = vadd.f32 %v2022_v16, %v2738_v34  ;;  %v783_v35 = vadd.f32 %v2733_v33, %v782_v30  ;;  %v1046_v43 = vpop.f32.mrb[31].mxu1  ;;  %1809 = vmatprep.subr.bf16.mxu0 %v1103_v10  ;;  %v822_v45 = vmax.f32 %v780_v28, 0.0  ;;  %v2160_v33 = vld [vmem:[#allocation5] ss:$8 sps:$4 sm:$0xff]  }
 0x1c3   : > { %v825_v27 = vmax.f32 %v791_v14, 0.0  ;;  %v1047_v38 = vadd.f32 %v2738_v34, %v1046_v43  ;;  %v2163_v34 = vld [vmem:[#allocation5 + $0x14] ss:$8 sps:$4 sm:$0xff]  }
 0x1c4   : > { %v1346_v57 = vpack.c.bf16 %v1055_v32, %v1052_v26  ;;  %v823_v36 = vmax.f32 %v783_v35, 0.0  ;;  %1874 = vmatpush3.bf16.msra.mxu1 %v1336_v41  ;;  %v2168_v41 = vld [vmem:[#allocation5 + $0x20] ss:$8 sps:$4 sm:$0xff]  }
 0x1c5   : > { %v1105_v37 = vpack.c.bf16 %v825_v27, %v824_v52  ;;  %v1345_v46 = vpack.c.bf16 %v1047_v38, %v1044_v7  ;;  %1810 = vmatpush3.bf16.msra.mxu0 %v2806_v44  ;;  %v2169_v44 = vld [vmem:[#allocation5 + $0x34] ss:$8 sps:$4 sm:$0xff]  }
 0x1c6   : > { %v1104_v40 = vpack.c.bf16 %v823_v36, %v822_v45 }
 0x1c7   : > { %1875 = vmatprep.subr.bf16.mxu1 %v1345_v46 }
 0x1c8   : > { %1876 = vmatpush3.bf16.msra.mxu1 %v1337_v19  ;;  %1811 = vmatprep.subr.bf16.mxu0 %v1104_v40  ;;  %v2180_v19 = vld [vmem:[#allocation5 + $0x60] ss:$8 sps:$4 sm:$0xff]  }
 0x1c9   : > { %1812 = vmatpush3.bf16.msra.mxu0 %v2834_v20  ;;  %1877 = vmatprep.subr.bf16.mxu1 %v1346_v57  ;;  %v2181_v20 = vld [vmem:[#allocation5 + $0x74] ss:$8 sps:$4 sm:$0xff]  }
 0x1ca   : > { %1813 = vmatprep.subr.bf16.mxu0 %v1105_v37 }
 0x1cc   : > { %1878 = vmatpush3.bf16.msra.mxu1 %v1338_v11  ;;  %v2177_v11 = vld [vmem:[#allocation5 + $0x50] ss:$8 sps:$4 sm:$0xff]  }
 0x1cd   : > { %1814 = vmatpush3.bf16.msra.mxu0 %v2830_v15  ;;  %v2178_v15 = vld [vmem:[#allocation5 + $0x64] ss:$8 sps:$4 sm:$0xff]  }
 0x1cf   : > { %1380 = vmatmul.mubr.bf16.vlgmr.msra.gmra.mrb[32].mxu1 %v2160_v33 }
 0x1d0   : > { %1219 = vmatmul.mubr.bf16.vlgmr.msra.gmra.mrb[32].mxu0 %v2160_v33  ;;  %1387 = vmatprep.mubr.bf16.mxu1 %v2163_v34 }
 0x1d1   : > { %1226 = vmatprep.mubr.bf16.mxu0 %v2163_v34 }
 0x1d7   : > { %1388 = vmatmul.mubr.bf16.gmra.mrb[36].mxu1 %v2165_v23 }
 0x1d8   : > { %1227 = vmatmul.mubr.bf16.gmra.mrb[36].mxu0 %v2165_v23  ;;  %1395 = vmatprep.mubr.bf16.mxu1 %v2166_v31 }
 0x1d9   : > { %1234 = vmatprep.mubr.bf16.mxu0 %v2166_v31 }
 0x1df   : > { %1396 = vmatmul.mubr.bf16.gmra.mrb[40].mxu1 %v2168_v41 }
 0x1e0   : > { %1235 = vmatmul.mubr.bf16.gmra.mrb[40].mxu0 %v2168_v41  ;;  %1403 = vmatprep.mubr.bf16.mxu1 %v2169_v44 }
 0x1e1   : > { %1242 = vmatprep.mubr.bf16.mxu0 %v2169_v44 }
 0x1e7   : > { %1404 = vmatmul.mubr.bf16.gmra.mrb[44].mxu1 %v2171_v53 }
 0x1e8   : > { %1243 = vmatmul.mubr.bf16.gmra.mrb[44].mxu0 %v2171_v53  ;;  %1411 = vmatprep.mubr.bf16.mxu1 %v2172_v61 }
 0x1e9   : > { %1250 = vmatprep.mubr.bf16.mxu0 %v2172_v61 }
 0x1ef   : > { %1412 = vmatmul.mubr.bf16.gmra.mrb[48].mxu1 %v2174_v2 }
 0x1f0   : > { %1251 = vmatmul.mubr.bf16.gmra.mrb[48].mxu0 %v2174_v2  ;;  %1419 = vmatprep.mubr.bf16.mxu1 %v2175_v9 }
 0x1f1   : > { %1258 = vmatprep.mubr.bf16.mxu0 %v2175_v9 }
 0x1f7   : > { %1420 = vmatmul.mubr.bf16.gmra.mrb[52].mxu1 %v2177_v11 }
 0x1f8   : > { %1259 = vmatmul.mubr.bf16.gmra.mrb[52].mxu0 %v2177_v11  ;;  %1427 = vmatprep.mubr.bf16.mxu1 %v2178_v15 }
 0x1f9   : > { %1266 = vmatprep.mubr.bf16.mxu0 %v2178_v15 }
 0x1ff   : > { %1428 = vmatmul.mubr.bf16.gmra.mrb[56].mxu1 %v2180_v19 }
 0x200   : > { %1267 = vmatmul.mubr.bf16.gmra.mrb[56].mxu0 %v2180_v19  ;;  %1435 = vmatprep.mubr.bf16.mxu1 %v2181_v20 }
 0x201   : > { %1274 = vmatprep.mubr.bf16.mxu0 %v2181_v20 }
 0x207   : > { %1436 = vmatmul.mubr.bf16.gmra.mrb[60].mxu1 %v2183_v42 }
 0x208   : > { %1275 = vmatmul.mubr.bf16.gmra.mrb[60].mxu0 %v2183_v42 }
 0x2a2   : > { %v1879_v58 = vpop.f32.mrb[32].mxu1 }
 0x2a3   : > { %v1815_v48 = vpop.f32.mrb[32].mxu0  ;;  %v1880_v49 = vpop.f32.mrb[33].mxu1 }
 0x2a4   : > { %v1816_v50 = vpop.f32.mrb[33].mxu0  ;;  %v1881_v51 = vadd.f32 %v1880_v49, %v1879_v58  ;;  %v1882_v55 = vpop.f32.mrb[34].mxu1 }
 0x2a5   : > { %v1817_v59 = vadd.f32 %v1816_v50, %v1815_v48  ;;  %v1818_v60 = vpop.f32.mrb[34].mxu0  ;;  %v1883_v39 = vpop.f32.mrb[35].mxu1 }
 0x2a6   : > { %v1819_v47 = vpop.f32.mrb[35].mxu0  ;;  %v1884_v54 = vadd.f32 %v1883_v39, %v1882_v55  ;;  %1460 = vst [vmem:[%s2901_s6] sm:$0xff] %v1881_v51 }
 0x2a7   : > { %v1820_v56 = vadd.f32 %v1819_v47, %v1818_v60  ;;  %1299 = vst [vmem:[%s2905_s18] sm:$0xff] %v1817_v59 }
 0x2a8   : > { %1461 = vst [vmem:[%s2901_s6 + $0x8] sm:$0xff] %v1884_v54 }
 0x2a9   : > { %1300 = vst [vmem:[%s2905_s18 + $0x8] sm:$0xff] %v1820_v56 }
 0x2aa   : > { %v1885_v62 = vpop.f32.mrb[36].mxu1 }
 0x2ab   : > { %v1821_v0 = vpop.f32.mrb[36].mxu0  ;;  %v1886_v1 = vpop.f32.mrb[37].mxu1 }
 0x2ac   : > { %v1822_v4 = vpop.f32.mrb[37].mxu0  ;;  %v1887_v5 = vadd.f32 %v1886_v1, %v1885_v62  ;;  %v1888_v3 = vpop.f32.mrb[38].mxu1 }
 0x2ad   : > { %v1823_v12 = vadd.f32 %v1822_v4, %v1821_v0  ;;  %v1824_v17 = vpop.f32.mrb[38].mxu0  ;;  %v1889_v6 = vpop.f32.mrb[39].mxu1 }
 0x2ae   : > { %v1825_v8 = vpop.f32.mrb[39].mxu0  ;;  %v1890_v10 = vadd.f32 %v1889_v6, %v1888_v3  ;;  %1462 = vst [vmem:[%s2901_s6 + $0x10] sm:$0xff] %v1887_v5 }
 0x2af   : > { %v1826_v18 = vadd.f32 %v1825_v8, %v1824_v17  ;;  %1301 = vst [vmem:[%s2905_s18 + $0x10] sm:$0xff] %v1823_v12 }
 0x2b0   : > { %1463 = vst [vmem:[%s2901_s6 + $0x18] sm:$0xff] %v1890_v10 }
 0x2b1   : > { %1302 = vst [vmem:[%s2905_s18 + $0x18] sm:$0xff] %v1826_v18 }
 0x2b2   : > { %v1891_v13 = vpop.f32.mrb[40].mxu1 }
 0x2b3   : > { %v1827_v21 = vpop.f32.mrb[40].mxu0  ;;  %v1892_v22 = vpop.f32.mrb[41].mxu1 }
 0x2b4   : > { %v1828_v24 = vpop.f32.mrb[41].mxu0  ;;  %v1893_v25 = vadd.f32 %v1892_v22, %v1891_v13  ;;  %v1894_v26 = vpop.f32.mrb[42].mxu1 }
 0x2b5   : > { %v1829_v28 = vadd.f32 %v1828_v24, %v1827_v21  ;;  %v1830_v29 = vpop.f32.mrb[42].mxu0  ;;  %v1895_v63 = vpop.f32.mrb[43].mxu1 }
 0x2b6   : > { %v1831_v7 = vpop.f32.mrb[43].mxu0  ;;  %v1896_v14 = vadd.f32 %v1895_v63, %v1894_v26  ;;  %1464 = vst [vmem:[%s2901_s6 + $0x20] sm:$0xff] %v1893_v25 }
 0x2b7   : > { %v1832_v16 = vadd.f32 %v1831_v7, %v1830_v29  ;;  %1303 = vst [vmem:[%s2905_s18 + $0x20] sm:$0xff] %v1829_v28 }
 0x2b8   : > { %1465 = vst [vmem:[%s2901_s6 + $0x28] sm:$0xff] %v1896_v14 }
 0x2b9   : > { %1304 = vst [vmem:[%s2905_s18 + $0x28] sm:$0xff] %v1832_v16 }
 0x2ba   : > { %v1897_v30 = vpop.f32.mrb[44].mxu1 }
 0x2bb   : > { %v1833_v32 = vpop.f32.mrb[44].mxu0  ;;  %v1898_v35 = vpop.f32.mrb[45].mxu1 }
 0x2bc   : > { %v1834_v43 = vpop.f32.mrb[45].mxu0  ;;  %v1899_v52 = vadd.f32 %v1898_v35, %v1897_v30  ;;  %v1900_v27 = vpop.f32.mrb[46].mxu1 }
 0x2bd   : > { %v1835_v38 = vadd.f32 %v1834_v43, %v1833_v32  ;;  %v1836_v45 = vpop.f32.mrb[46].mxu0  ;;  %v1901_v57 = vpop.f32.mrb[47].mxu1 }
 0x2be   : > { %v1837_v36 = vpop.f32.mrb[47].mxu0  ;;  %v1902_v37 = vadd.f32 %v1901_v57, %v1900_v27  ;;  %1466 = vst [vmem:[%s2901_s6 + $0x30] sm:$0xff] %v1899_v52 }
 0x2bf   : > { %v1838_v46 = vadd.f32 %v1837_v36, %v1836_v45  ;;  %1305 = vst [vmem:[%s2905_s18 + $0x30] sm:$0xff] %v1835_v38 }
 0x2c0   : > { %1467 = vst [vmem:[%s2901_s6 + $0x38] sm:$0xff] %v1902_v37 }
 0x2c1   : > { %1306 = vst [vmem:[%s2905_s18 + $0x38] sm:$0xff] %v1838_v46 }
 0x2c2   : > { %v1903_v40 = vpop.f32.mrb[48].mxu1 }
 0x2c3   : > { %v1839_v33 = vpop.f32.mrb[48].mxu0  ;;  %v1904_v34 = vpop.f32.mrb[49].mxu1 }
 0x2c4   : > { %v1840_v23 = vpop.f32.mrb[49].mxu0  ;;  %v1905_v31 = vadd.f32 %v1904_v34, %v1903_v40  ;;  %v1906_v41 = vpop.f32.mrb[50].mxu1 }
 0x2c5   : > { %v1841_v44 = vadd.f32 %v1840_v23, %v1839_v33  ;;  %v1842_v53 = vpop.f32.mrb[50].mxu0  ;;  %v1907_v61 = vpop.f32.mrb[51].mxu1 }
 0x2c6   : > { %v1843_v2 = vpop.f32.mrb[51].mxu0  ;;  %v1908_v9 = vadd.f32 %v1907_v61, %v1906_v41  ;;  %1468 = vst [vmem:[%s2901_s6 + $0x40] sm:$0xff] %v1905_v31 }
 0x2c7   : > { %v1844_v11 = vadd.f32 %v1843_v2, %v1842_v53  ;;  %1307 = vst [vmem:[%s2905_s18 + $0x40] sm:$0xff] %v1841_v44 }
 0x2c8   : > { %1469 = vst [vmem:[%s2901_s6 + $0x48] sm:$0xff] %v1908_v9 }
 0x2c9   : > { %1308 = vst [vmem:[%s2905_s18 + $0x48] sm:$0xff] %v1844_v11 }
 0x2ca   : > { %v1909_v15 = vpop.f32.mrb[52].mxu1 }
 0x2cb   : > { %v1845_v19 = vpop.f32.mrb[52].mxu0  ;;  %v1910_v20 = vpop.f32.mrb[53].mxu1 }
 0x2cc   : > { %v1846_v42 = vpop.f32.mrb[53].mxu0  ;;  %v1911_v58 = vadd.f32 %v1910_v20, %v1909_v15  ;;  %v1912_v48 = vpop.f32.mrb[54].mxu1 }
 0x2cd   : > { %v1847_v49 = vadd.f32 %v1846_v42, %v1845_v19  ;;  %v1848_v50 = vpop.f32.mrb[54].mxu0  ;;  %v1913_v51 = vpop.f32.mrb[55].mxu1 }
 0x2ce   : > { %v1849_v55 = vpop.f32.mrb[55].mxu0  ;;  %v1914_v59 = vadd.f32 %v1913_v51, %v1912_v48  ;;  %1470 = vst [vmem:[%s2901_s6 + $0x50] sm:$0xff] %v1911_v58 }
 0x2cf   : > { %v1850_v60 = vadd.f32 %v1849_v55, %v1848_v50  ;;  %1309 = vst [vmem:[%s2905_s18 + $0x50] sm:$0xff] %v1847_v49 }
 0x2d0   : > { %1471 = vst [vmem:[%s2901_s6 + $0x58] sm:$0xff] %v1914_v59 }
 0x2d1   : > { %1310 = vst [vmem:[%s2905_s18 + $0x58] sm:$0xff] %v1850_v60 }
 0x2d2   : > { %v1915_v39 = vpop.f32.mrb[56].mxu1 }
 0x2d3   : > { %v1851_v47 = vpop.f32.mrb[56].mxu0  ;;  %v1916_v54 = vpop.f32.mrb[57].mxu1 }
 0x2d4   : > { %v1852_v56 = vpop.f32.mrb[57].mxu0  ;;  %v1917_v62 = vadd.f32 %v1916_v54, %v1915_v39  ;;  %v1918_v0 = vpop.f32.mrb[58].mxu1 }
 0x2d5   : > { %v1853_v1 = vadd.f32 %v1852_v56, %v1851_v47  ;;  %v1854_v4 = vpop.f32.mrb[58].mxu0  ;;  %v1919_v5 = vpop.f32.mrb[59].mxu1 }
 0x2d6   : > { %v1855_v3 = vpop.f32.mrb[59].mxu0  ;;  %v1920_v12 = vadd.f32 %v1919_v5, %v1918_v0  ;;  %1472 = vst [vmem:[%s2901_s6 + $0x60] sm:$0xff] %v1917_v62 }
 0x2d7   : > { %v1856_v17 = vadd.f32 %v1855_v3, %v1854_v4  ;;  %1311 = vst [vmem:[%s2905_s18 + $0x60] sm:$0xff] %v1853_v1 }
 0x2d8   : > { %1473 = vst [vmem:[%s2901_s6 + $0x68] sm:$0xff] %v1920_v12 }
 0x2d9   : > { %1312 = vst [vmem:[%s2905_s18 + $0x68] sm:$0xff] %v1856_v17 }
 0x2da   : > { %v1921_v6 = vpop.f32.mrb[60].mxu1 }
 0x2db   : > { %v1857_v8 = vpop.f32.mrb[60].mxu0  ;;  %v1922_v10 = vpop.f32.mrb[61].mxu1 }
 0x2dc   : > { %v1858_v18 = vpop.f32.mrb[61].mxu0  ;;  %v1923_v13 = vadd.f32 %v1922_v10, %v1921_v6  ;;  %v1924_v21 = vpop.f32.mrb[62].mxu1 }
 0x2dd   : > { %v1859_v22 = vadd.f32 %v1858_v18, %v1857_v8  ;;  %v1860_v24 = vpop.f32.mrb[62].mxu0  ;;  %v1925_v25 = vpop.f32.mrb[63].mxu1 }
 0x2de   : > { %v1861_v26 = vpop.f32.mrb[63].mxu0  ;;  %v1926_v28 = vadd.f32 %v1925_v25, %v1924_v21  ;;  %1474 = vst [vmem:[%s2901_s6 + $0x70] sm:$0xff] %v1923_v13 }
 0x2df   : > { %v1862_v29 = vadd.f32 %v1861_v26, %v1860_v24  ;;  %1313 = vst [vmem:[%s2905_s18 + $0x70] sm:$0xff] %v1859_v22 }
 0x2e0   : > { %1475 = vst [vmem:[%s2901_s6 + $0x78] sm:$0xff] %v1926_v28 }
 0x2e1   : > { %1314 = vst [vmem:[%s2905_s18 + $0x78] sm:$0xff] %v1862_v29 }
 0x2e2   : > { %2311 = shalt.err (!%p2308_p0)
}
 0x2e3   : > { %s2312_s6 = scalar_lea.hbm %s2941_s23, 2048  ;;  %s2316_s21 = scalar_lea.hbm %s3039_s7, 4096 }
 0x2e4   : > { %p2313_p4 = scmp.ne.s32.totalorder %s2941_s23, %s2312_s6  ;;  %p2317_p12 = scmp.lt.u32.totalorder %s2941_s23, %s3039_s7 }
 0x2e5   : > { %p2318_p1 = scmp.lt.u32.totalorder %s2316_s21, %s2312_s6  ;;  %p2320_p13 = scmp.lt.u32.totalorder %s2312_s6, %s2941_s23 }
 0x2e6   : > { %p2314_p2 = pnand %p2313_p4, %p2634_p3 }
 0x2e7   : > { %p2319_p7 = por %p2318_p1, %p2317_p12 }
 0x2e8   : > { %p2315_p8 = pneg %p2314_p2 }
 0x2e9   : > { %p2321_p6 = por %p2320_p13, %p2319_p7 }
 0x2eb   : > { %p2322_p10 = pnand %p2321_p6, %p2315_p8 }
 0x2ed   : > { %2325 = shalt.err (!%p2322_p10)
}
 0x2ee   : > { %s2431_s27 = smov 128   ;;  %s2432_s9 = smov 8  }
 0x2ef   : > { %2038 = dma.vmem_to_hbm [thread:$0]  (%p2634_p3), %s2943_s16, 2048, %s2941_s23, %s1482_s17, %s2431_s27, %s2431_s27, %s2432_s9  }
 0x2f0   : > { %s1477_s11 = scalar_lea.sflag [#allocation4], %s2693_s22  ;;  %s2326_s13 = scalar_lea.vmem %s2951_s15, 2048 }
 0x2f1   : > { %p2327_p11 = scmp.ne.s32.totalorder %s2951_s15, %s2326_s13  ;;  %s2433_s24 = smov [#allocation10]  }
 0x2f2   : > { %s2330_s6 = sshll.u32 %s2433_s24, 4  ;;  %s2331_s6 = int_to_ptr.vmem [resolvable:$false] %s2330_s6 }
 0x2f3   : > { %p2328_p5 = pnand %p2327_p11, %p2634_p3  ;;  %s2332_s18 = scalar_lea.vmem %s2331_s6, 4096 }
 0x2f4   : > { %p2333_p0 = scmp.lt.s32.totalorder %s2951_s15, %s2331_s6  ;;  %p2334_p4 = scmp.lt.s32.totalorder %s2332_s18, %s2326_s13 }
 0x2f5   : > { %p2329_p9 = pneg %p2328_p5 }
 0x2f6   : > { %p2335_p2 = por %p2334_p4, %p2333_p0 }
 0x2f8   : > { %p2336_p8 = pnand %p2335_p2, %p2329_p9 }
 0x2fa   : > { %2339 = shalt.err (!%p2336_p8)
}
 0x2fb   : > { %s2340_s16 = scalar_lea.hbm %s2949_s12, 2048  ;;  %s2344_s1 = scalar_lea.hbm %s3066_s19, 4096 }
 0x2fc   : > { %p2341_p12 = scmp.ne.s32.totalorder %s2949_s12, %s2340_s16  ;;  %p2345_p13 = scmp.lt.u32.totalorder %s2949_s12, %s3066_s19 }
 0x2fd   : > { %p2346_p6 = scmp.lt.u32.totalorder %s2344_s1, %s2340_s16  ;;  %p2348_p11 = scmp.lt.u32.totalorder %s2340_s16, %s2949_s12 }
 0x2fe   : > { %p2342_p1 = pnand %p2341_p12, %p2634_p3 }
 0x2ff   : > { %p2347_p10 = por %p2346_p6, %p2345_p13 }
 0x300   : > { %p2343_p7 = pneg %p2342_p1 }
 0x301   : > { %p2349_p5 = por %p2348_p11, %p2347_p10 }
 0x303   : > { %p2350_p9 = pnand %p2349_p5, %p2343_p7 }
 0x305   : > { %2353 = shalt.err (!%p2350_p9)
}
 0x306   : > { %2037 = dma.vmem_to_hbm [thread:$0]  (%p2634_p3), %s2951_s15, 2048, %s2949_s12, %s1477_s11, %s2431_s27, %s2431_s27, %s2432_s9  }
 0x307 PF: > { %s3067_s14 = sld [smem:[#allocation18_spill]]  ;;  %s3068_s13 = sld [smem:[#allocation19_spill]] }
 0x308   : > { %p3070_p4 = scmp.ge.s32.totalorder %s2420_s29, 2 }
 0x30d   : > { %s1530_s24 = sand.u32 1, %s3067_s14   ;;  %p3069_p0 = scmp.ne.s32.totalorder %s3068_s13, 0 }
 0x30e   : > { %s1531_s6 = scalar_lea.sflag [#allocation4], %s1530_s24 }
 0x30f   : > { %p2056_p2 = pnand %p3070_p4, %p3069_p0 }
 0x311   : > { %2391 = dma.done.wait (!%p2056_p2), %s1531_s6, 2048  }
 0x312   : > { %2393 = vsyncadd (!%p2056_p2), %s1531_s6, 4294965248  ;;  %s1540_s20 = scalar_lea.sflag [#allocation12], %s1530_s24 }
 0x313   : > { %2395 = dma.done.wait (!%p2056_p2), %s1540_s20, 2048  }
 0x314   : > { %2397 = vsyncadd (!%p2056_p2), %s1540_s20, 4294965248  ;;  %s29_s29 = sadd.s32 1, %s2420_s29   ;;  %s3071_s24 = smov %s2404_s25 }
 0x315   : > { %p26_p8 = scmp.ge.s32.totalorder %s29_s29, 4   ;;  %s3072_s25 = smov %s2408_s26 }
 0x316   : > { %s3073_s26 = smov %s2643_s8  ;;  %s3074_s27 = smov %s2416_s28 }
 0x317   : > { %s3075_s28 = smov %s3077_s30  ;;  %28 = sbr.rel (!%p26_p8) target bundleno = 13 (0xd), region = 123 }
 0x31e   :  { %1545 = vsyncpa [#allocation3], 1 }
 0x31f   :  { %1547 = vsyncpa [#allocation3 + $0x1], 1 }
 0x320   :  { %1548 = vsyncpa [#allocation6], 1 }
 0x321   :  { %1549 = vsyncpa [#allocation9], 1 }
 0x322   :  { %1550 = vsyncpa [#allocation4], 1 }
 0x323   :  { %1552 = vsyncpa [#allocation4 + $0x1], 1 }
 0x324   :  { %1553 = vsyncpa [#allocation12], 1 }
 0x325   :  { %1555 = vsyncpa [#allocation12 + $0x1], 1 }

// kernel: tpu_custom_call.1
= control target key start
LH: loop header
LB: loop body
LE: loop exit
PB: predicated region body
PF: predicated region fallthrough
CT: control target
= control target key end

     0   :  { %s3032_s0 = inlined_call_operand.hbm [shape: bf16[2,256,128], index: 0, kind: input, shape index: {}]   ;;  %s3033_s1 = inlined_call_operand.hbm [shape: bf16[128,256], index: 1, kind: input, shape index: {}]   ;;  %s3034_s2 = inlined_call_operand.hbm [shape: bf16[128,128], index: 2, kind: input, shape index: {}]   ;;  %s3035_s3 = inlined_call_operand.vmem [shape: f32[1,128], index: 3, kind: input, shape index: {}]   ;;  %s3036_s4 = inlined_call_operand.hbm [shape: bf16[128,128], index: 4, kind: input, shape index: {}]   ;;  %s3037_s5 = inlined_call_operand.vmem [shape: f32[1,128], index: 5, kind: input, shape index: {}]   ;;  %s3038_s6 = inlined_call_operand.hbm [shape: f32[2,1,128,128], index: 6, kind: output, shape index: {0}]   ;;  %s3039_s7 = inlined_call_operand.hbm [shape: f32[2,1,128,128], index: 7, kind: output, shape index: {1}]  }
   0x1   :  { %3047 = sst [smem:[#allocation20_spill]] %s3033_s1 }
   0x2   :  { %3048 = sst [smem:[#allocation21_spill]] %s3038_s6 }
   0x3   :  { %13 = vsyncpa [#allocation3], 0 }
   0x4   :  { %15 = vsyncpa [#allocation3 + $0x1], 0 }
   0x5   :  { %16 = vsyncpa [#allocation6], 0 }
   0x6   :  { %17 = vsyncpa [#allocation9], 0 }
   0x7   :  { %18 = vsyncpa [#allocation4], 0 }
   0x8   :  { %20 = vsyncpa [#allocation4 + $0x1], 0 }
   0x9   :  { %21 = vsyncpa [#allocation12], 0 }
   0xa   :  { %23 = vsyncpa [#allocation12 + $0x1], 0  ;;  %s2474_s24 = smov 0   ;;  %s2476_s25 = smov 0  }
   0xb   :  { %s2478_s26 = smov 0   ;;  %s2480_s27 = smov 0  }
   0xc   :  { %s2482_s28 = smov 0   ;;  %s2484_s29 = smov 0  }
   0xd LB: > { %3049 = sst [smem:[#allocation18_spill]] %s2400_s24  ;;  %s1673_s30 = sadd.s32 4294967295, %s2420_s29   ;;  %s2420_s29 = sphi %s2484_s29, %s29_s29   ;;  %s2416_s28 = sphi %s2482_s28, %s3075_s28   ;;  %s2412_s27 = sphi %s2480_s27, %s3074_s27   ;;  %s2408_s26 = sphi %s2478_s26, %s3073_s26   ;;  %s2404_s25 = sphi %s2476_s25, %s3072_s25   ;;  %s2400_s24 = sphi %s2474_s24, %s3071_s24  }
   0xe   : > { %s1674_s8 = sadd.s32 4294967294, %s2420_s29   ;;  %p72_p0 = scmp.ne.s32.totalorder %s2404_s25, %s2400_s24 }
   0xf   : > { %p2508_p1 = scmp.eq.s32.totalorder %s1673_s30, 0  ;;  %p2512_p2 = scmp.eq.s32.totalorder %s1673_s30, 1 }
  0x10   : > { %p216_p3 = scmp.eq.s32.totalorder %s1674_s8, 1  ;;  %p1675_p5 = scmp.ge.s32.totalorder %s2420_s29, 1 }
  0x11   : > { %s3050_s9 = scalar_select %p2508_p1, 1, 0 }
  0x12   : > { %s3051_s10 = scalar_select %p2512_p2, 1, 0 }
  0x13   : > { %p2518_p4 = por %p2508_p1, %p72_p0  ;;  %p2523_p6 = por %p216_p3, %p72_p0 }
  0x14   : > { %p251_p7 = scmp.lt.s32.totalorder %s2420_s29, 3  ;;  %s2422_s14 = smov [#allocation5]  }
  0x15   : > { %s3052_s11 = scalar_select %p2518_p4, 1, 0 }
  0x16   : > { %s3053_s12 = scalar_select %p2523_p6, 1, 0 }
  0x17   : > { %p2528_p8 = pnand %p1675_p5, %p251_p7  ;;  %s267_s15 = sshll.u32 %s2422_s14, 4  ;;  %s2532_s15 = int_to_ptr.vmem [resolvable:$true] %s267_s15 }
  0x18   : > { %3054 = sst [smem:[#allocation19_spill]] %s3053_s12  ;;  %s2423_s17 = smov [#allocation7]  }
  0x19   : > { %s3055_s13 = scalar_select %p2528_p8, 1, 0 }
  0x1a   : > { %p2041_p9 = pneg %p2528_p8  ;;  %s280_s18 = sshll.u32 %s2423_s17, 4  ;;  %s2543_s18 = int_to_ptr.vmem [resolvable:$true] %s280_s18 }
  0x1b   : > { %s3057_s1 = sld [smem:[#allocation20_spill]] }
  0x1c   : > { %p2539_p11 = pnand %p2041_p9, %p2508_p1 }
  0x1e   : > { %p2553_p13 = pneg %p2539_p11 }
  0x21   : > { %s2184_s21 = scalar_lea.hbm %s3057_s1, 2048 }
  0x22   : > { %p2185_p12 = scmp.ne.s32.totalorder %s3057_s1, %s2184_s21  ;;  %p2191_p5 = scmp.lt.u32.totalorder %s2184_s21, %s3057_s1 }
  0x24   : > { %p2187_p0 = pnand %p2553_p13, %p2185_p12 }
  0x26   : > { %p2188_p3 = pneg %p2187_p0 }
  0x28   : > { %p2193_p7 = pnand %p2191_p5, %p2188_p3 }
  0x2a   : > { %2196 = shalt.err (!%p2193_p7)
}
  0x2b   : > { %s2197_s17 = scalar_lea.vmem %s2532_s15, 2048  ;;  %p2205_p1 = scmp.lt.s32.totalorder %s2532_s15, %s2532_s15 }
  0x2c   : > { %p2198_p9 = scmp.ne.s32.totalorder %s2532_s15, %s2197_s17  ;;  %p2206_p4 = scmp.lt.s32.totalorder %s2197_s17, %s2197_s17 }
  0x2e   : > { %p2200_p10 = pnand %p2198_p9, %p2553_p13  ;;  %p2207_p12 = por %p2206_p4, %p2205_p1 }
  0x30   : > { %p2201_p6 = pneg %p2200_p10 }
  0x32   : > { %p2208_p0 = pnand %p2207_p12, %p2201_p6 }
  0x34   : > { %2211 = shalt.err (!%p2208_p0)
}
  0x35   : > { %s2424_s19 = smov 128   ;;  %s2425_s20 = smov 8  }
  0x36   : > { %2044 = dma.hbm_to_vmem [thread:$0]  (!%p2539_p11), %s3057_s1, 2048, %s2532_s15, [#allocation6], %s2424_s19, %s2424_s19, %s2425_s20  }
  0x37   : > { %s2212_s14 = scalar_lea.hbm %s3034_s2, 1024 }
  0x38   : > { %p2213_p1 = scmp.ne.s32.totalorder %s3034_s2, %s2212_s14  ;;  %p2219_p10 = scmp.lt.u32.totalorder %s2212_s14, %s3034_s2 }
  0x3a   : > { %p2215_p4 = pnand %p2213_p1, %p2553_p13 }
  0x3c   : > { %p2216_p6 = pneg %p2215_p4 }
  0x3e   : > { %p2221_p3 = pnand %p2219_p10, %p2216_p6 }
  0x40   : > { %2224 = shalt.err (!%p2221_p3)
}
  0x41   : > { %s2225_s15 = scalar_lea.vmem %s2543_s18, 1024  ;;  %p2233_p12 = scmp.lt.s32.totalorder %s2543_s18, %s2543_s18 }
  0x42   : > { %p2226_p5 = scmp.ne.s32.totalorder %s2543_s18, %s2225_s15  ;;  %p2234_p0 = scmp.lt.s32.totalorder %s2225_s15, %s2225_s15 }
  0x44   : > { %p2228_p7 = pnand %p2226_p5, %p2553_p13  ;;  %p2235_p1 = por %p2234_p0, %p2233_p12 }
  0x46   : > { %p2229_p9 = pneg %p2228_p7 }
  0x48   : > { %p2236_p4 = pnand %p2235_p1, %p2229_p9 }
  0x4a   : > { %2239 = shalt.err (!%p2236_p4)
}
  0x4b   : > { %s2426_s24 = smov 64   ;;  %s2427_s6 = smov 4  }
  0x4c   : > { %2047 = dma.hbm_to_vmem [thread:$0]  (!%p2539_p11), %s3034_s2, 1024, %s2543_s18, [#allocation6], %s2426_s24, %s2426_s24, %s2427_s6  }
  0x4d   : > { %s2428_s20 = smov [#allocation8]   ;;  %s2240_s8 = scalar_lea.hbm %s3036_s4, 1024 }
  0x4e   : > { %s296_s21 = sshll.u32 %s2428_s20, 4  ;;  %p2241_p6 = scmp.ne.s32.totalorder %s3036_s4, %s2240_s8  ;;  %s297_s21 = int_to_ptr.vmem [resolvable:$true] %s296_s21 }
  0x4f   : > { %p2247_p5 = scmp.lt.u32.totalorder %s2240_s8, %s3036_s4 }
  0x50   : > { %p2243_p10 = pnand %p2241_p6, %p2553_p13 }
  0x52   : > { %p2244_p3 = pneg %p2243_p10 }
  0x54   : > { %p2249_p7 = pnand %p2247_p5, %p2244_p3 }
  0x56   : > { %2252 = shalt.err (!%p2249_p7)
}
  0x57   : > { %s2253_s18 = scalar_lea.vmem %s297_s21, 1024  ;;  %p2261_p1 = scmp.lt.s32.totalorder %s297_s21, %s297_s21 }
  0x58   : > { %p2254_p9 = scmp.ne.s32.totalorder %s297_s21, %s2253_s18  ;;  %p2262_p4 = scmp.lt.s32.totalorder %s2253_s18, %s2253_s18 }
  0x5a   : > { %p2256_p12 = pnand %p2254_p9, %p2553_p13  ;;  %p2263_p8 = por %p2262_p4, %p2261_p1 }
  0x5c   : > { %p2257_p0 = pneg %p2256_p12 }
  0x5e   : > { %p2264_p2 = pnand %p2263_p8, %p2257_p0 }
  0x60   : > { %2267 = shalt.err (!%p2264_p2)
}
  0x61   : > { %2050 = dma.hbm_to_vmem [thread:$0]  (!%p2539_p11), %s3036_s4, 1024, %s297_s21, [#allocation9], %s2426_s24, %s2426_s24, %s2427_s6  }
  0x62   : > { %s48_s30 = sadd.s32 1, %s2416_s28  ;;  %s59_s16 = sadd.s32 1, %s2408_s26 }
  0x63   : > { %p50_p2 = scmp.ge.s32.totalorder %s48_s30, 2  ;;  %p66_p8 = scmp.ne.s32.totalorder %s2408_s26, %s2404_s25 }
  0x64   : > { %p67_p13 = scmp.eq.s32.totalorder %s2420_s29, 0  ;;  %p3060_p10 = scmp.ne.s32.totalorder %s3051_s10, 0 }
  0x65   : > { %s3077_s30 = smov (%p50_p2, %s48_s30), 0  ;;  %p2065_p11 = scmp.lt.s32.totalorder %s2420_s29, 2 }
  0x66   : > { %p2628_p6 = por %p67_p13, %p66_p8  ;;  %p2634_p3 = por %p3060_p10, %p66_p8 }
  0x67   : > { %s54_s22 = ssub.s32 %s2416_s28, %s3077_s30  ;;  %s313_s21 = sand.u32 1, %s2408_s26  }
  0x68   : > { %p57_p5 = scmp.eq.s32.totalorder %s54_s22, 0  ;;  %s1680_s23 = sshll.u32 %s313_s21, 7 }
  0x69   : > { %s1748_s14 = sshll.u32 %s2416_s28, 11  ;;  %s317_s10 = scalar_lea.vmem [#allocation2], %s1680_s23 }
  0x6a   : > { %s2643_s8 = scalar_select %p57_p5, %s2408_s26, %s59_s16  }
  0x6b   : > { %s2649_s18 = scalar_lea.hbm %s3032_s0, %s1748_s14  ;;  %s327_s1 = sshll.u32 %s317_s10, 4  ;;  %s2651_s1 = int_to_ptr.vmem [resolvable:$true] %s327_s1 }
  0x6c   : > { %p2655_p7 = pnand %p2065_p11, %p2628_p6  ;;  %s2659_s16 = scalar_lea.sflag [#allocation3], %s313_s21 }
  0x6d   : > { %s2268_s22 = scalar_lea.hbm %s2649_s18, 2048  ;;  %s2273_s19 = scalar_lea.hbm %s3032_s0, 4096 }
  0x6e   : > { %p2269_p9 = scmp.ne.s32.totalorder %s2649_s18, %s2268_s22  ;;  %p2270_p12 = pneg %p2655_p7 }
  0x6f   : > { %p2274_p4 = scmp.lt.u32.totalorder %s2649_s18, %s3032_s0  ;;  %p2275_p2 = scmp.lt.u32.totalorder %s2273_s19, %s2268_s22 }
  0x70   : > { %p2271_p0 = pnand %p2270_p12, %p2269_p9  ;;  %p2277_p13 = scmp.lt.u32.totalorder %s2268_s22, %s2649_s18 }
  0x71   : > { %p2276_p8 = por %p2275_p2, %p2274_p4 }
  0x72   : > { %p2272_p1 = pneg %p2271_p0 }
  0x73   : > { %p2278_p6 = por %p2277_p13, %p2276_p8 }
  0x75   : > { %p2279_p10 = pnand %p2278_p6, %p2272_p1 }
  0x77   : > { %2282 = shalt.err (!%p2279_p10)
}
  0x78   : > { %s2283_s21 = scalar_lea.vmem %s2651_s1, 2048  ;;  %s2429_s10 = smov [#allocation2]  }
  0x79   : > { %p2284_p11 = scmp.ne.s32.totalorder %s2651_s1, %s2283_s21  ;;  %s2288_s23 = sshll.u32 %s2429_s10, 4  ;;  %s2289_s23 = int_to_ptr.vmem [resolvable:$false] %s2288_s23 }
  0x7a   : > { %s2290_s14 = scalar_lea.vmem %s2289_s23, 4096  ;;  %p2291_p0 = scmp.lt.s32.totalorder %s2651_s1, %s2289_s23 }
  0x7b   : > { %p2286_p5 = pnand %p2284_p11, %p2270_p12  ;;  %p2292_p4 = scmp.lt.s32.totalorder %s2290_s14, %s2283_s21 }
  0x7d   : > { %p2287_p9 = pneg %p2286_p5  ;;  %p2293_p2 = por %p2292_p4, %p2291_p0 }
  0x7f   : > { %p2294_p8 = pnand %p2293_p2, %p2287_p9 }
  0x81   : > { %2297 = shalt.err (!%p2294_p8)
}
  0x82   : > { %2054 = dma.hbm_to_vmem [thread:$0]  (!%p2655_p7), %s2649_s18, 2048, %s2651_s1, %s2659_s16, %s2426_s24, %s2426_s24, %s2427_s6  }
  0x83   : > { %p3063_p12 = scmp.ne.s32.totalorder %s3055_s13, 0 }
  0x84   : > { %s2693_s22 = sand.u32 (!%p3063_p12), 1, %s2404_s25   ;;  %p3064_p1 = scmp.ne.s32.totalorder (!%p3063_p12), %s3052_s11, 0 }
  0x85   : > { %339 = sbr.rel (%p3063_p12) target bundleno = 775 (0x307), region = 44  ;;  %s2696_s19 = sshll.u32 (!%p3063_p12), %s2693_s22, 7 }
  0x86   : > { %s342_s12 = scalar_lea.sflag (!%p3063_p12), [#allocation3], %s2693_s22  ;;  %s2700_s17 = scalar_lea.vmem (!%p3063_p12), [#allocation2], %s2696_s19 }
  0x8c   : > { %2379 = dma.done.wait (%p3064_p1), %s342_s12, 2048  }
  0x8d   : > { %2381 = vsyncadd (%p3064_p1), %s342_s12, 4294965248  ;;  %p3065_p7 = scmp.ne.s32.totalorder %s3050_s9, 0 }
  0x8f   : > { %2383 = dma.done.wait (%p3065_p7), [#allocation6], 3072  }
  0x90   : > { %2385 = vsyncadd (%p3065_p7), [#allocation6], 4294964224 }
  0x91   : > { %2387 = dma.done.wait (%p3065_p7), [#allocation9], 1024  }
  0x92   : > { %2389 = vsyncadd (%p3065_p7), [#allocation9], 4294966272  ;;  %v2128_v0 = vld [vmem:[#allocation7] sm:$0xff]   ;;  %v2130_v2 = vld [vmem:[#allocation7 + $0x8] sm:$0xff]   ;;  %s2901_s6 = scalar_lea.vmem [#allocation11], %s2696_s19  ;;  %s2905_s18 = scalar_lea.vmem [#allocation10], %s2696_s19 }
  0x93   : > { %v2129_v1 = vld [vmem:[#allocation8] sm:$0xff]   ;;  %1927 = vmatprep.subr.bf16.mxu0 %v2128_v0  ;;  %v2131_v3 = vld [vmem:[#allocation8 + $0x8] sm:$0xff]   ;;  %v2132_v4 = vld [vmem:[#allocation7 + $0x10] sm:$0xff]   ;;  %s1749_s1 = sshll.u32 %s2412_s27, 11  ;;  %s1515_s16 = sshll.u32 %s2901_s6, 4  ;;  %s2943_s16 = int_to_ptr.vmem [resolvable:$true] %s1515_s16 }
  0x94   : > { %1975 = vmatprep.subr.bf16.mxu1 %v2129_v1  ;;  %1928 = vmatpush3.bf16.msra.mxu0 %v2128_v0  ;;  %v2133_v5 = vld [vmem:[#allocation8 + $0x10] sm:$0xff]   ;;  %v2134_v6 = vld [vmem:[#allocation7 + $0x18] sm:$0xff]   ;;  %v2136_v8 = vld [vmem:[#allocation7 + $0x20] sm:$0xff]   ;;  %s1497_s15 = sshll.u32 %s2905_s18, 4  ;;  %s2941_s23 = scalar_lea.hbm %s3039_s7, %s1749_s1  ;;  %s2951_s15 = int_to_ptr.vmem [resolvable:$true] %s1497_s15 }
  0x95   : > { %1976 = vmatpush3.bf16.msra.mxu1 %v2129_v1  ;;  %1929 = vmatprep.subr.bf16.mxu0 %v2130_v2  ;;  %v2135_v7 = vld [vmem:[#allocation8 + $0x18] sm:$0xff]   ;;  %v2137_v9 = vld [vmem:[#allocation8 + $0x20] sm:$0xff]   ;;  %v2138_v10 = vld [vmem:[#allocation7 + $0x28] sm:$0xff]   ;;  %s3066_s19 = sld [smem:[#allocation21_spill]]  ;;  %s2298_s9 = scalar_lea.vmem %s2943_s16, 2048 }
  0x96   : > { %1977 = vmatprep.subr.bf16.mxu1 %v2131_v3  ;;  %v2144_v11 = vld [vmem:[%s2700_s17] sm:$0xff]   ;;  %v2139_v12 = vld [vmem:[#allocation8 + $0x28] sm:$0xff]   ;;  %v2140_v13 = vld [vmem:[#allocation7 + $0x30] sm:$0xff]   ;;  %p2299_p13 = scmp.ne.s32.totalorder %s2943_s16, %s2298_s9  ;;  %s2430_s11 = smov [#allocation11]  }
  0x97   : > { %1943 = vmatprep.mubr.bf16.mxu0 %v2144_v11  ;;  %1991 = vmatprep.mubr.bf16.mxu1 %v2144_v11  ;;  %v2141_v14 = vld [vmem:[#allocation8 + $0x30] sm:$0xff]   ;;  %v2142_v15 = vld [vmem:[#allocation7 + $0x38] sm:$0xff]   ;;  %v2145_v17 = vld [vmem:[%s2700_s17 + $0x8] sm:$0xff]   ;;  %s2302_s13 = sshll.u32 %s2430_s11, 4  ;;  %s2303_s13 = int_to_ptr.vmem [resolvable:$false] %s2302_s13 }
  0x98   : > { %1930 = vmatpush3.bf16.msra.mxu0 %v2130_v2  ;;  %v2143_v16 = vld [vmem:[#allocation8 + $0x38] sm:$0xff]   ;;  %v2146_v18 = vld [vmem:[%s2700_s17 + $0x10] sm:$0xff]   ;;  %v2148_v20 = vld [vmem:[%s2700_s17 + $0x20] sm:$0xff]   ;;  %p2300_p6 = pnand %p2299_p13, %p2634_p3  ;;  %s2304_s24 = scalar_lea.vmem %s2303_s13, 4096 }
  0x99   : > { %1978 = vmatpush3.bf16.msra.mxu1 %v2131_v3  ;;  %1931 = vmatprep.subr.bf16.mxu0 %v2132_v4  ;;  %v2147_v19 = vld [vmem:[%s2700_s17 + $0x18] sm:$0xff]   ;;  %v2149_v21 = vld [vmem:[%s2700_s17 + $0x28] sm:$0xff]   ;;  %v2150_v22 = vld [vmem:[%s2700_s17 + $0x30] sm:$0xff]   ;;  %p2305_p11 = scmp.lt.s32.totalorder %s2943_s16, %s2303_s13  ;;  %p2306_p5 = scmp.lt.s32.totalorder %s2304_s24, %s2298_s9 }
  0x9a   : > { %1979 = vmatprep.subr.bf16.mxu1 %v2133_v5  ;;  %v2151_v23 = vld [vmem:[%s2700_s17 + $0x38] sm:$0xff]   ;;  %v2152_v24 = vld [vmem:[%s2700_s17 + $0x40] sm:$0xff]   ;;  %v2153_v25 = vld [vmem:[%s2700_s17 + $0x48] sm:$0xff]   ;;  %p2301_p10 = pneg %p2300_p6 }
  0x9b   : > { %v2154_v26 = vld [vmem:[%s2700_s17 + $0x50] sm:$0xff]   ;;  %v2155_v27 = vld [vmem:[%s2700_s17 + $0x58] sm:$0xff]   ;;  %v2156_v28 = vld [vmem:[%s2700_s17 + $0x60] sm:$0xff]   ;;  %s2949_s12 = scalar_lea.hbm %s3066_s19, %s1749_s1  ;;  %p2307_p9 = por %p2306_p5, %p2305_p11 }
  0x9c   : > { %1932 = vmatpush3.bf16.msra.mxu0 %v2132_v4  ;;  %v2157_v29 = vld [vmem:[%s2700_s17 + $0x68] sm:$0xff]   ;;  %v2158_v30 = vld [vmem:[%s2700_s17 + $0x70] sm:$0xff]   ;;  %v2159_v31 = vld [vmem:[%s2700_s17 + $0x78] sm:$0xff]   ;;  %s1482_s17 = scalar_lea.sflag [#allocation12], %s2693_s22 }
  0x9d   : > { %1980 = vmatpush3.bf16.msra.mxu1 %v2133_v5  ;;  %1933 = vmatprep.subr.bf16.mxu0 %v2134_v6  ;;  %v2162_v32 = vld [vmem:[#allocation5 + $0x4] ss:$8 sps:$4 sm:$0xff]   ;;  %v2733_v33 = vld [vmem:[%s3035_s3] ss:$0 sm:$0xff]  ;;  %p2308_p0 = pnand %p2307_p9, %p2301_p10 }
  0x9e   : > { %1981 = vmatprep.subr.bf16.mxu1 %v2135_v7  ;;  %v2738_v34 = vld [vmem:[%s3037_s5] ss:$0 sm:$0xff] }
  0xa0   : > { %1934 = vmatpush3.bf16.msra.mxu0 %v2134_v6 }
  0xa1   : > { %1982 = vmatpush3.bf16.msra.mxu1 %v2135_v7  ;;  %1935 = vmatprep.subr.bf16.mxu0 %v2136_v8 }
  0xa2   : > { %1983 = vmatprep.subr.bf16.mxu1 %v2137_v9 }
  0xa4   : > { %1936 = vmatpush3.bf16.msra.mxu0 %v2136_v8 }
  0xa5   : > { %1984 = vmatpush3.bf16.msra.mxu1 %v2137_v9  ;;  %1937 = vmatprep.subr.bf16.mxu0 %v2138_v10 }
  0xa6   : > { %1985 = vmatprep.subr.bf16.mxu1 %v2139_v12 }
  0xa8   : > { %1938 = vmatpush3.bf16.msra.mxu0 %v2138_v10 }
  0xa9   : > { %1986 = vmatpush3.bf16.msra.mxu1 %v2139_v12  ;;  %1939 = vmatprep.subr.bf16.mxu0 %v2140_v13 }
  0xaa   : > { %1987 = vmatprep.subr.bf16.mxu1 %v2141_v14 }
  0xac   : > { %1940 = vmatpush3.bf16.msra.mxu0 %v2140_v13 }
  0xad   : > { %1988 = vmatpush3.bf16.msra.mxu1 %v2141_v14  ;;  %1941 = vmatprep.subr.bf16.mxu0 %v2142_v15 }
  0xae   : > { %1989 = vmatprep.subr.bf16.mxu1 %v2143_v16 }
  0xb0   : > { %1942 = vmatpush3.bf16.msra.mxu0 %v2142_v15 }
  0xb1   : > { %1990 = vmatpush3.bf16.msra.mxu1 %v2143_v16 }
  0xb3   : > { %1944 = vmatmul.mubr.bf16.vlgmr.msra.gmra.mrb[0].mxu0 %v2145_v17 }
  0xb4   : > { %1992 = vmatmul.mubr.bf16.vlgmr.msra.gmra.mrb[0].mxu1 %v2145_v17  ;;  %1947 = vmatprep.mubr.bf16.mxu0 %v2146_v18 }
  0xb5   : > { %1995 = vmatprep.mubr.bf16.mxu1 %v2146_v18 }
  0xbb   : > { %1948 = vmatmul.mubr.bf16.gmra.mrb[4].mxu0 %v2147_v19 }
  0xbc   : > { %1996 = vmatmul.mubr.bf16.gmra.mrb[4].mxu1 %v2147_v19  ;;  %1951 = vmatprep.mubr.bf16.mxu0 %v2148_v20 }
  0xbd   : > { %1999 = vmatprep.mubr.bf16.mxu1 %v2148_v20 }
  0xc3   : > { %1952 = vmatmul.mubr.bf16.gmra.mrb[8].mxu0 %v2149_v21 }
  0xc4   : > { %2000 = vmatmul.mubr.bf16.gmra.mrb[8].mxu1 %v2149_v21  ;;  %1955 = vmatprep.mubr.bf16.mxu0 %v2150_v22 }
  0xc5   : > { %2003 = vmatprep.mubr.bf16.mxu1 %v2150_v22 }
  0xcb   : > { %1956 = vmatmul.mubr.bf16.gmra.mrb[12].mxu0 %v2151_v23 }
  0xcc   : > { %2004 = vmatmul.mubr.bf16.gmra.mrb[12].mxu1 %v2151_v23  ;;  %1959 = vmatprep.mubr.bf16.mxu0 %v2152_v24 }
  0xcd   : > { %2007 = vmatprep.mubr.bf16.mxu1 %v2152_v24 }
  0xd3   : > { %1960 = vmatmul.mubr.bf16.gmra.mrb[16].mxu0 %v2153_v25 }
  0xd4   : > { %2008 = vmatmul.mubr.bf16.gmra.mrb[16].mxu1 %v2153_v25  ;;  %1963 = vmatprep.mubr.bf16.mxu0 %v2154_v26 }
  0xd5   : > { %2011 = vmatprep.mubr.bf16.mxu1 %v2154_v26 }
  0xdb   : > { %1964 = vmatmul.mubr.bf16.gmra.mrb[20].mxu0 %v2155_v27 }
  0xdc   : > { %2012 = vmatmul.mubr.bf16.gmra.mrb[20].mxu1 %v2155_v27  ;;  %1967 = vmatprep.mubr.bf16.mxu0 %v2156_v28 }
  0xdd   : > { %2015 = vmatprep.mubr.bf16.mxu1 %v2156_v28 }
  0xe3   : > { %1968 = vmatmul.mubr.bf16.gmra.mrb[24].mxu0 %v2157_v29 }
  0xe4   : > { %2016 = vmatmul.mubr.bf16.gmra.mrb[24].mxu1 %v2157_v29  ;;  %1971 = vmatprep.mubr.bf16.mxu0 %v2158_v30 }
  0xe5   : > { %2019 = vmatprep.mubr.bf16.mxu1 %v2158_v30 }
  0xeb   : > { %1972 = vmatmul.mubr.bf16.gmra.mrb[28].mxu0 %v2159_v31 }
  0xec   : > { %2020 = vmatmul.mubr.bf16.gmra.mrb[28].mxu1 %v2159_v31  ;;  %1218 = vmatprep.mubr.bf16.mxu0 %v2162_v32 }
  0xed   : > { %1379 = vmatprep.mubr.bf16.mxu1 %v2162_v32 }
 0x186   : > { %v1945_v35 = vpop.f32.mrb[0].mxu0 }
 0x187   : > { %v676_v36 = vadd.f32 %v1945_v35, %v2733_v33  ;;  %v1993_v37 = vpop.f32.mrb[0].mxu1  ;;  %v667_v38 = vpop.f32.mrb[1].mxu0 }
 0x188   : > { %v2742_v39 = vadd.f32 %v1993_v37, %v2738_v34  ;;  %v668_v40 = vadd.f32 %v2733_v33, %v667_v38  ;;  %v931_v41 = vpop.f32.mrb[1].mxu1  ;;  %v1946_v42 = vpop.f32.mrb[2].mxu0 }
 0x189   : > { %v2746_v43 = vadd.f32 %v2738_v34, %v931_v41  ;;  %v679_v44 = vadd.f32 %v1946_v42, %v2733_v33  ;;  %v1994_v45 = vpop.f32.mrb[2].mxu1  ;;  %v670_v46 = vpop.f32.mrb[3].mxu0  ;;  %v796_v50 = vmax.f32 %v676_v36, 0.0 }
 0x18a   : > { %v2750_v47 = vadd.f32 %v1994_v45, %v2738_v34  ;;  %v671_v48 = vadd.f32 %v2733_v33, %v670_v46  ;;  %v934_v49 = vpop.f32.mrb[3].mxu1  ;;  %v794_v53 = vmax.f32 %v668_v40, 0.0 }
 0x18b   : > { %v797_v51 = vmax.f32 %v679_v44, 0.0  ;;  %v2754_v52 = vadd.f32 %v2738_v34, %v934_v49 }
 0x18c   : > { %v1332_v54 = vpack.c.bf16 %v2750_v47, %v2742_v39  ;;  %v795_v55 = vmax.f32 %v671_v48, 0.0 }
 0x18d   : > { %v2758_v56 = vpack.c.bf16 %v797_v51, %v796_v50  ;;  %v1331_v57 = vpack.c.bf16 %v2754_v52, %v2746_v43 }
 0x18e   : > { %v2762_v58 = vpack.c.bf16 %v795_v55, %v794_v53  ;;  %v1949_v59 = vpop.f32.mrb[4].mxu0 }
 0x18f   : > { %v692_v60 = vadd.f32 %v1949_v59, %v2733_v33  ;;  %v1997_v61 = vpop.f32.mrb[4].mxu1  ;;  %v683_v62 = vpop.f32.mrb[5].mxu0 }
 0x190   : > { %v2766_v63 = vadd.f32 %v1997_v61, %v2738_v34  ;;  %v684_v0 = vadd.f32 %v2733_v33, %v683_v62  ;;  %v947_v1 = vpop.f32.mrb[5].mxu1  ;;  %v1950_v2 = vpop.f32.mrb[6].mxu0 }
 0x191   : > { %v2770_v3 = vadd.f32 %v2738_v34, %v947_v1  ;;  %v695_v4 = vadd.f32 %v1950_v2, %v2733_v33  ;;  %v1998_v5 = vpop.f32.mrb[6].mxu1  ;;  %v686_v6 = vpop.f32.mrb[7].mxu0  ;;  %v800_v10 = vmax.f32 %v692_v60, 0.0 }
 0x192   : > { %v2774_v7 = vadd.f32 %v1998_v5, %v2738_v34  ;;  %v687_v8 = vadd.f32 %v2733_v33, %v686_v6  ;;  %v950_v9 = vpop.f32.mrb[7].mxu1  ;;  %v798_v13 = vmax.f32 %v684_v0, 0.0 }
 0x193   : > { %v801_v11 = vmax.f32 %v695_v4, 0.0  ;;  %v2778_v12 = vadd.f32 %v2738_v34, %v950_v9 }
 0x194   : > { %v1334_v14 = vpack.c.bf16 %v2774_v7, %v2766_v63  ;;  %v799_v15 = vmax.f32 %v687_v8, 0.0 }
 0x195   : > { %v2782_v16 = vpack.c.bf16 %v801_v11, %v800_v10  ;;  %v1333_v17 = vpack.c.bf16 %v2778_v12, %v2770_v3 }
 0x196   : > { %v2786_v18 = vpack.c.bf16 %v799_v15, %v798_v13  ;;  %v1953_v19 = vpop.f32.mrb[8].mxu0 }
 0x197   : > { %v708_v20 = vadd.f32 %v1953_v19, %v2733_v33  ;;  %v2001_v21 = vpop.f32.mrb[8].mxu1  ;;  %v699_v22 = vpop.f32.mrb[9].mxu0 }
 0x198   : > { %v2790_v23 = vadd.f32 %v2001_v21, %v2738_v34  ;;  %v700_v24 = vadd.f32 %v2733_v33, %v699_v22  ;;  %v963_v25 = vpop.f32.mrb[9].mxu1  ;;  %v1954_v26 = vpop.f32.mrb[10].mxu0 }
 0x199   : > { %v2794_v27 = vadd.f32 %v2738_v34, %v963_v25  ;;  %v711_v28 = vadd.f32 %v1954_v26, %v2733_v33  ;;  %v2002_v29 = vpop.f32.mrb[10].mxu1  ;;  %v702_v30 = vpop.f32.mrb[11].mxu0  ;;  %v804_v36 = vmax.f32 %v708_v20, 0.0 }
 0x19a   : > { %v2798_v31 = vadd.f32 %v2002_v29, %v2738_v34  ;;  %v703_v32 = vadd.f32 %v2733_v33, %v702_v30  ;;  %v966_v35 = vpop.f32.mrb[11].mxu1  ;;  %v802_v40 = vmax.f32 %v700_v24, 0.0 }
 0x19b   : > { %v805_v37 = vmax.f32 %v711_v28, 0.0  ;;  %v2802_v38 = vadd.f32 %v2738_v34, %v966_v35 }
 0x19c   : > { %v1336_v41 = vpack.c.bf16 %v2798_v31, %v2790_v23  ;;  %v803_v42 = vmax.f32 %v703_v32, 0.0  ;;  %v2165_v23 = vld [vmem:[#allocation5 + $0x10] ss:$8 sps:$4 sm:$0xff]   ;;  %v2166_v31 = vld [vmem:[#allocation5 + $0x24] ss:$8 sps:$4 sm:$0xff]  }
 0x19d   : > { %v2806_v44 = vpack.c.bf16 %v805_v37, %v804_v36  ;;  %v1335_v45 = vpack.c.bf16 %v2802_v38, %v2794_v27 }
 0x19e   : > { %v2810_v46 = vpack.c.bf16 %v803_v42, %v802_v40  ;;  %v1957_v48 = vpop.f32.mrb[12].mxu0 }
 0x19f   : > { %v724_v49 = vadd.f32 %v1957_v48, %v2733_v33  ;;  %v2005_v50 = vpop.f32.mrb[12].mxu1  ;;  %v715_v51 = vpop.f32.mrb[13].mxu0 }
 0x1a0   : > { %v2814_v53 = vadd.f32 %v2005_v50, %v2738_v34  ;;  %v716_v55 = vadd.f32 %v2733_v33, %v715_v51  ;;  %v979_v59 = vpop.f32.mrb[13].mxu1  ;;  %v1958_v60 = vpop.f32.mrb[14].mxu0 }
 0x1a1   : > { %v2818_v61 = vadd.f32 %v2738_v34, %v979_v59  ;;  %v727_v62 = vadd.f32 %v1958_v60, %v2733_v33  ;;  %v2006_v0 = vpop.f32.mrb[14].mxu1  ;;  %v718_v1 = vpop.f32.mrb[15].mxu0  ;;  %v808_v6 = vmax.f32 %v724_v49, 0.0 }
 0x1a2   : > { %v2822_v2 = vadd.f32 %v2006_v0, %v2738_v34  ;;  %v719_v4 = vadd.f32 %v2733_v33, %v718_v1  ;;  %v982_v5 = vpop.f32.mrb[15].mxu1  ;;  %v806_v10 = vmax.f32 %v716_v55, 0.0 }
 0x1a3   : > { %v809_v8 = vmax.f32 %v727_v62, 0.0  ;;  %v2826_v9 = vadd.f32 %v2738_v34, %v982_v5 }
 0x1a4   : > { %v1338_v11 = vpack.c.bf16 %v2822_v2, %v2814_v53  ;;  %v807_v13 = vmax.f32 %v719_v4, 0.0  ;;  %v2171_v53 = vld [vmem:[#allocation5 + $0x30] ss:$8 sps:$4 sm:$0xff]   ;;  %v2174_v2 = vld [vmem:[#allocation5 + $0x40] ss:$8 sps:$4 sm:$0xff]  }
 0x1a5   : > { %v2830_v15 = vpack.c.bf16 %v809_v8, %v808_v6  ;;  %v1337_v19 = vpack.c.bf16 %v2826_v9, %v2818_v61  ;;  %v2172_v61 = vld [vmem:[#allocation5 + $0x44] ss:$8 sps:$4 sm:$0xff]   ;;  %v2175_v9 = vld [vmem:[#allocation5 + $0x54] ss:$8 sps:$4 sm:$0xff]  }
 0x1a6   : > { %v2834_v20 = vpack.c.bf16 %v807_v13, %v806_v10  ;;  %v1961_v21 = vpop.f32.mrb[16].mxu0 }
 0x1a7   : > { %v740_v22 = vadd.f32 %v1961_v21, %v2733_v33  ;;  %v2009_v24 = vpop.f32.mrb[16].mxu1  ;;  %v731_v25 = vpop.f32.mrb[17].mxu0 }
 0x1a8   : > { %v1004_v26 = vadd.f32 %v2009_v24, %v2738_v34  ;;  %v732_v28 = vadd.f32 %v2733_v33, %v731_v25  ;;  %v995_v29 = vpop.f32.mrb[17].mxu1  ;;  %v1962_v30 = vpop.f32.mrb[18].mxu0 }
 0x1a9   : > { %v996_v32 = vadd.f32 %v2738_v34, %v995_v29  ;;  %v743_v35 = vadd.f32 %v1962_v30, %v2733_v33  ;;  %v2010_v36 = vpop.f32.mrb[18].mxu1  ;;  %v734_v37 = vpop.f32.mrb[19].mxu0  ;;  %v812_v49 = vmax.f32 %v740_v22, 0.0 }
 0x1aa   : > { %v1007_v40 = vadd.f32 %v2010_v36, %v2738_v34  ;;  %v735_v42 = vadd.f32 %v2733_v33, %v734_v37  ;;  %v998_v48 = vpop.f32.mrb[19].mxu1  ;;  %v810_v55 = vmax.f32 %v732_v28, 0.0 }
 0x1ab   : > { %v813_v50 = vmax.f32 %v743_v35, 0.0  ;;  %v999_v51 = vadd.f32 %v2738_v34, %v998_v48 }
 0x1ac   : > { %v1340_v59 = vpack.c.bf16 %v1007_v40, %v1004_v26  ;;  %v811_v60 = vmax.f32 %v735_v42, 0.0 }
 0x1ad   : > { %v1099_v62 = vpack.c.bf16 %v813_v50, %v812_v49  ;;  %v1339_v0 = vpack.c.bf16 %v999_v51, %v996_v32 }
 0x1ae   : > { %v1098_v1 = vpack.c.bf16 %v811_v60, %v810_v55  ;;  %v1965_v4 = vpop.f32.mrb[20].mxu0 }
 0x1af   : > { %v756_v5 = vadd.f32 %v1965_v4, %v2733_v33  ;;  %v2013_v6 = vpop.f32.mrb[20].mxu1  ;;  %1863 = vmatprep.subr.bf16.mxu1 %v1339_v0  ;;  %v747_v8 = vpop.f32.mrb[21].mxu0 }
 0x1b0   : > { %v1020_v10 = vadd.f32 %v2013_v6, %v2738_v34  ;;  %v748_v13 = vadd.f32 %v2733_v33, %v747_v8  ;;  %v1011_v21 = vpop.f32.mrb[21].mxu1  ;;  %1864 = vmatpush3.bf16.msra.mxu1 %v1331_v57  ;;  %v1966_v22 = vpop.f32.mrb[22].mxu0  ;;  %1799 = vmatprep.subr.bf16.mxu0 %v1098_v1 }
 0x1b1   : > { %v1012_v24 = vadd.f32 %v2738_v34, %v1011_v21  ;;  %v759_v25 = vadd.f32 %v1966_v22, %v2733_v33  ;;  %v2014_v26 = vpop.f32.mrb[22].mxu1  ;;  %1865 = vmatprep.subr.bf16.mxu1 %v1340_v59  ;;  %v750_v28 = vpop.f32.mrb[23].mxu0  ;;  %1800 = vmatpush3.bf16.msra.mxu0 %v2762_v58  ;;  %v816_v35 = vmax.f32 %v756_v5, 0.0 }
 0x1b2   : > { %v1023_v29 = vadd.f32 %v2014_v26, %v2738_v34  ;;  %v751_v30 = vadd.f32 %v2733_v33, %v750_v28  ;;  %v1014_v32 = vpop.f32.mrb[23].mxu1  ;;  %1801 = vmatprep.subr.bf16.mxu0 %v1099_v62  ;;  %v814_v57 = vmax.f32 %v748_v13, 0.0 }
 0x1b3   : > { %v817_v43 = vmax.f32 %v759_v25, 0.0  ;;  %v1015_v52 = vadd.f32 %v2738_v34, %v1014_v32 }
 0x1b4   : > { %v1342_v36 = vpack.c.bf16 %v1023_v29, %v1020_v10  ;;  %v815_v37 = vmax.f32 %v751_v30, 0.0  ;;  %1866 = vmatpush3.bf16.msra.mxu1 %v1332_v54 }
 0x1b5   : > { %v1101_v40 = vpack.c.bf16 %v817_v43, %v816_v35  ;;  %v1341_v42 = vpack.c.bf16 %v1015_v52, %v1012_v24  ;;  %1802 = vmatpush3.bf16.msra.mxu0 %v2758_v56 }
 0x1b6   : > { %v1100_v58 = vpack.c.bf16 %v815_v37, %v814_v57  ;;  %v1969_v48 = vpop.f32.mrb[24].mxu0 }
 0x1b7   : > { %v772_v49 = vadd.f32 %v1969_v48, %v2733_v33  ;;  %v2017_v50 = vpop.f32.mrb[24].mxu1  ;;  %1867 = vmatprep.subr.bf16.mxu1 %v1341_v42  ;;  %v763_v51 = vpop.f32.mrb[25].mxu0  ;;  %v2183_v42 = vld [vmem:[#allocation5 + $0x70] ss:$8 sps:$4 sm:$0xff]  }
 0x1b8   : > { %v1036_v55 = vadd.f32 %v2017_v50, %v2738_v34  ;;  %v764_v59 = vadd.f32 %v2733_v33, %v763_v51  ;;  %v1027_v60 = vpop.f32.mrb[25].mxu1  ;;  %1868 = vmatpush3.bf16.msra.mxu1 %v1333_v17  ;;  %v1970_v39 = vpop.f32.mrb[26].mxu0  ;;  %1803 = vmatprep.subr.bf16.mxu0 %v1100_v58 }
 0x1b9   : > { %v1028_v47 = vadd.f32 %v2738_v34, %v1027_v60  ;;  %v775_v54 = vadd.f32 %v1970_v39, %v2733_v33  ;;  %v2018_v56 = vpop.f32.mrb[26].mxu1  ;;  %v766_v62 = vpop.f32.mrb[27].mxu0  ;;  %1804 = vmatpush3.bf16.msra.mxu0 %v2786_v18  ;;  %1869 = vmatprep.subr.bf16.mxu1 %v1342_v36  ;;  %v820_v5 = vmax.f32 %v772_v49, 0.0 }
 0x1ba   : > { %v1039_v0 = vadd.f32 %v2018_v56, %v2738_v34  ;;  %v767_v1 = vadd.f32 %v2733_v33, %v766_v62  ;;  %v1030_v4 = vpop.f32.mrb[27].mxu1  ;;  %1805 = vmatprep.subr.bf16.mxu0 %v1101_v40  ;;  %v818_v17 = vmax.f32 %v764_v59, 0.0 }
 0x1bb   : > { %v821_v3 = vmax.f32 %v775_v54, 0.0  ;;  %v1031_v12 = vadd.f32 %v2738_v34, %v1030_v4 }
 0x1bc   : > { %v1344_v6 = vpack.c.bf16 %v1039_v0, %v1036_v55  ;;  %v819_v8 = vmax.f32 %v767_v1, 0.0  ;;  %1870 = vmatpush3.bf16.msra.mxu1 %v1334_v14 }
 0x1bd   : > { %v1103_v10 = vpack.c.bf16 %v821_v3, %v820_v5  ;;  %v1343_v18 = vpack.c.bf16 %v1031_v12, %v1028_v47  ;;  %1806 = vmatpush3.bf16.msra.mxu0 %v2782_v16 }
 0x1be   : > { %v1102_v13 = vpack.c.bf16 %v819_v8, %v818_v17  ;;  %v1973_v21 = vpop.f32.mrb[28].mxu0 }
 0x1bf   : > { %v788_v22 = vadd.f32 %v1973_v21, %v2733_v33  ;;  %v2021_v24 = vpop.f32.mrb[28].mxu1  ;;  %1871 = vmatprep.subr.bf16.mxu1 %v1343_v18  ;;  %v779_v25 = vpop.f32.mrb[29].mxu0 }
 0x1c0   : > { %v1052_v26 = vadd.f32 %v2021_v24, %v2738_v34  ;;  %v780_v28 = vadd.f32 %v2733_v33, %v779_v25  ;;  %v1043_v29 = vpop.f32.mrb[29].mxu1  ;;  %1872 = vmatpush3.bf16.msra.mxu1 %v1335_v45  ;;  %v1974_v63 = vpop.f32.mrb[30].mxu0  ;;  %1807 = vmatprep.subr.bf16.mxu0 %v1102_v13 }
 0x1c1   : > { %v1044_v7 = vadd.f32 %v2738_v34, %v1043_v29  ;;  %v791_v14 = vadd.f32 %v1974_v63, %v2733_v33  ;;  %v2022_v16 = vpop.f32.mrb[30].mxu1  ;;  %v782_v30 = vpop.f32.mrb[31].mxu0  ;;  %1808 = vmatpush3.bf16.msra.mxu0 %v2810_v46  ;;  %1873 = vmatprep.subr.bf16.mxu1 %v1344_v6  ;;  %v824_v52 = vmax.f32 %v788_v22, 0.0 }
 0x1c2   : > { %v1055_v32 = vadd.f32 %v2022_v16, %v2738_v34  ;;  %v783_v35 = vadd.f32 %v2733_v33, %v782_v30  ;;  %v1046_v43 = vpop.f32.mrb[31].mxu1  ;;  %1809 = vmatprep.subr.bf16.mxu0 %v1103_v10  ;;  %v822_v45 = vmax.f32 %v780_v28, 0.0  ;;  %v2160_v33 = vld [vmem:[#allocation5] ss:$8 sps:$4 sm:$0xff]  }
 0x1c3   : > { %v825_v27 = vmax.f32 %v791_v14, 0.0  ;;  %v1047_v38 = vadd.f32 %v2738_v34, %v1046_v43  ;;  %v2163_v34 = vld [vmem:[#allocation5 + $0x14] ss:$8 sps:$4 sm:$0xff]  }
 0x1c4   : > { %v1346_v57 = vpack.c.bf16 %v1055_v32, %v1052_v26  ;;  %v823_v36 = vmax.f32 %v783_v35, 0.0  ;;  %1874 = vmatpush3.bf16.msra.mxu1 %v1336_v41  ;;  %v2168_v41 = vld [vmem:[#allocation5 + $0x20] ss:$8 sps:$4 sm:$0xff]  }
 0x1c5   : > { %v1105_v37 = vpack.c.bf16 %v825_v27, %v824_v52  ;;  %v1345_v46 = vpack.c.bf16 %v1047_v38, %v1044_v7  ;;  %1810 = vmatpush3.bf16.msra.mxu0 %v2806_v44  ;;  %v2169_v44 = vld [vmem:[#allocation5 + $0x34] ss:$8 sps:$4 sm:$0xff]  }
 0x1c6   : > { %v1104_v40 = vpack.c.bf16 %v823_v36, %v822_v45 }
 0x1c7   : > { %1875 = vmatprep.subr.bf16.mxu1 %v1345_v46 }
 0x1c8   : > { %1876 = vmatpush3.bf16.msra.mxu1 %v1337_v19  ;;  %1811 = vmatprep.subr.bf16.mxu0 %v1104_v40  ;;  %v2180_v19 = vld [vmem:[#allocation5 + $0x60] ss:$8 sps:$4 sm:$0xff]  }
 0x1c9   : > { %1812 = vmatpush3.bf16.msra.mxu0 %v2834_v20  ;;  %1877 = vmatprep.subr.bf16.mxu1 %v1346_v57  ;;  %v2181_v20 = vld [vmem:[#allocation5 + $0x74] ss:$8 sps:$4 sm:$0xff]  }
 0x1ca   : > { %1813 = vmatprep.subr.bf16.mxu0 %v1105_v37 }
 0x1cc   : > { %1878 = vmatpush3.bf16.msra.mxu1 %v1338_v11  ;;  %v2177_v11 = vld [vmem:[#allocation5 + $0x50] ss:$8 sps:$4 sm:$0xff]  }
 0x1cd   : > { %1814 = vmatpush3.bf16.msra.mxu0 %v2830_v15  ;;  %v2178_v15 = vld [vmem:[#allocation5 + $0x64] ss:$8 sps:$4 sm:$0xff]  }
 0x1cf   : > { %1380 = vmatmul.mubr.bf16.vlgmr.msra.gmra.mrb[32].mxu1 %v2160_v33 }
 0x1d0   : > { %1219 = vmatmul.mubr.bf16.vlgmr.msra.gmra.mrb[32].mxu0 %v2160_v33  ;;  %1387 = vmatprep.mubr.bf16.mxu1 %v2163_v34 }
 0x1d1   : > { %1226 = vmatprep.mubr.bf16.mxu0 %v2163_v34 }
 0x1d7   : > { %1388 = vmatmul.mubr.bf16.gmra.mrb[36].mxu1 %v2165_v23 }
 0x1d8   : > { %1227 = vmatmul.mubr.bf16.gmra.mrb[36].mxu0 %v2165_v23  ;;  %1395 = vmatprep.mubr.bf16.mxu1 %v2166_v31 }
 0x1d9   : > { %1234 = vmatprep.mubr.bf16.mxu0 %v2166_v31 }
 0x1df   : > { %1396 = vmatmul.mubr.bf16.gmra.mrb[40].mxu1 %v2168_v41 }
 0x1e0   : > { %1235 = vmatmul.mubr.bf16.gmra.mrb[40].mxu0 %v2168_v41  ;;  %1403 = vmatprep.mubr.bf16.mxu1 %v2169_v44 }
 0x1e1   : > { %1242 = vmatprep.mubr.bf16.mxu0 %v2169_v44 }
 0x1e7   : > { %1404 = vmatmul.mubr.bf16.gmra.mrb[44].mxu1 %v2171_v53 }
 0x1e8   : > { %1243 = vmatmul.mubr.bf16.gmra.mrb[44].mxu0 %v2171_v53  ;;  %1411 = vmatprep.mubr.bf16.mxu1 %v2172_v61 }
 0x1e9   : > { %1250 = vmatprep.mubr.bf16.mxu0 %v2172_v61 }
 0x1ef   : > { %1412 = vmatmul.mubr.bf16.gmra.mrb[48].mxu1 %v2174_v2 }
 0x1f0   : > { %1251 = vmatmul.mubr.bf16.gmra.mrb[48].mxu0 %v2174_v2  ;;  %1419 = vmatprep.mubr.bf16.mxu1 %v2175_v9 }
 0x1f1   : > { %1258 = vmatprep.mubr.bf16.mxu0 %v2175_v9 }
 0x1f7   : > { %1420 = vmatmul.mubr.bf16.gmra.mrb[52].mxu1 %v2177_v11 }
 0x1f8   : > { %1259 = vmatmul.mubr.bf16.gmra.mrb[52].mxu0 %v2177_v11  ;;  %1427 = vmatprep.mubr.bf16.mxu1 %v2178_v15 }
 0x1f9   : > { %1266 = vmatprep.mubr.bf16.mxu0 %v2178_v15 }
 0x1ff   : > { %1428 = vmatmul.mubr.bf16.gmra.mrb[56].mxu1 %v2180_v19 }
 0x200   : > { %1267 = vmatmul.mubr.bf16.gmra.mrb[56].mxu0 %v2180_v19  ;;  %1435 = vmatprep.mubr.bf16.mxu1 %v2181_v20 }
 0x201   : > { %1274 = vmatprep.mubr.bf16.mxu0 %v2181_v20 }
 0x207   : > { %1436 = vmatmul.mubr.bf16.gmra.mrb[60].mxu1 %v2183_v42 }
 0x208   : > { %1275 = vmatmul.mubr.bf16.gmra.mrb[60].mxu0 %v2183_v42 }
 0x2a2   : > { %v1879_v58 = vpop.f32.mrb[32].mxu1 }
 0x2a3   : > { %v1815_v48 = vpop.f32.mrb[32].mxu0  ;;  %v1880_v49 = vpop.f32.mrb[33].mxu1 }
 0x2a4   : > { %v1816_v50 = vpop.f32.mrb[33].mxu0  ;;  %v1881_v51 = vadd.f32 %v1880_v49, %v1879_v58  ;;  %v1882_v55 = vpop.f32.mrb[34].mxu1 }
 0x2a5   : > { %v1817_v59 = vadd.f32 %v1816_v50, %v1815_v48  ;;  %v1818_v60 = vpop.f32.mrb[34].mxu0  ;;  %v1883_v39 = vpop.f32.mrb[35].mxu1 }
 0x2a6   : > { %v1819_v47 = vpop.f32.mrb[35].mxu0  ;;  %v1884_v54 = vadd.f32 %v1883_v39, %v1882_v55  ;;  %1460 = vst [vmem:[%s2901_s6] sm:$0xff] %v1881_v51 }
 0x2a7   : > { %v1820_v56 = vadd.f32 %v1819_v47, %v1818_v60  ;;  %1299 = vst [vmem:[%s2905_s18] sm:$0xff] %v1817_v59 }
 0x2a8   : > { %1461 = vst [vmem:[%s2901_s6 + $0x8] sm:$0xff] %v1884_v54 }
 0x2a9   : > { %1300 = vst [vmem:[%s2905_s18 + $0x8] sm:$0xff] %v1820_v56 }
 0x2aa   : > { %v1885_v62 = vpop.f32.mrb[36].mxu1 }
 0x2ab   : > { %v1821_v0 = vpop.f32.mrb[36].mxu0  ;;  %v1886_v1 = vpop.f32.mrb[37].mxu1 }
 0x2ac   : > { %v1822_v4 = vpop.f32.mrb[37].mxu0  ;;  %v1887_v5 = vadd.f32 %v1886_v1, %v1885_v62  ;;  %v1888_v3 = vpop.f32.mrb[38].mxu1 }
 0x2ad   : > { %v1823_v12 = vadd.f32 %v1822_v4, %v1821_v0  ;;  %v1824_v17 = vpop.f32.mrb[38].mxu0  ;;  %v1889_v6 = vpop.f32.mrb[39].mxu1 }
 0x2ae   : > { %v1825_v8 = vpop.f32.mrb[39].mxu0  ;;  %v1890_v10 = vadd.f32 %v1889_v6, %v1888_v3  ;;  %1462 = vst [vmem:[%s2901_s6 + $0x10] sm:$0xff] %v1887_v5 }
 0x2af   : > { %v1826_v18 = vadd.f32 %v1825_v8, %v1824_v17  ;;  %1301 = vst [vmem:[%s2905_s18 + $0x10] sm:$0xff] %v1823_v12 }
 0x2b0   : > { %1463 = vst [vmem:[%s2901_s6 + $0x18] sm:$0xff] %v1890_v10 }
 0x2b1   : > { %1302 = vst [vmem:[%s2905_s18 + $0x18] sm:$0xff] %v1826_v18 }
 0x2b2   : > { %v1891_v13 = vpop.f32.mrb[40].mxu1 }
 0x2b3   : > { %v1827_v21 = vpop.f32.mrb[40].mxu0  ;;  %v1892_v22 = vpop.f32.mrb[41].mxu1 }
 0x2b4   : > { %v1828_v24 = vpop.f32.mrb[41].mxu0  ;;  %v1893_v25 = vadd.f32 %v1892_v22, %v1891_v13  ;;  %v1894_v26 = vpop.f32.mrb[42].mxu1 }
 0x2b5   : > { %v1829_v28 = vadd.f32 %v1828_v24, %v1827_v21  ;;  %v1830_v29 = vpop.f32.mrb[42].mxu0  ;;  %v1895_v63 = vpop.f32.mrb[43].mxu1 }
 0x2b6   : > { %v1831_v7 = vpop.f32.mrb[43].mxu0  ;;  %v1896_v14 = vadd.f32 %v1895_v63, %v1894_v26  ;;  %1464 = vst [vmem:[%s2901_s6 + $0x20] sm:$0xff] %v1893_v25 }
 0x2b7   : > { %v1832_v16 = vadd.f32 %v1831_v7, %v1830_v29  ;;  %1303 = vst [vmem:[%s2905_s18 + $0x20] sm:$0xff] %v1829_v28 }
 0x2b8   : > { %1465 = vst [vmem:[%s2901_s6 + $0x28] sm:$0xff] %v1896_v14 }
 0x2b9   : > { %1304 = vst [vmem:[%s2905_s18 + $0x28] sm:$0xff] %v1832_v16 }
 0x2ba   : > { %v1897_v30 = vpop.f32.mrb[44].mxu1 }
 0x2bb   : > { %v1833_v32 = vpop.f32.mrb[44].mxu0  ;;  %v1898_v35 = vpop.f32.mrb[45].mxu1 }
 0x2bc   : > { %v1834_v43 = vpop.f32.mrb[45].mxu0  ;;  %v1899_v52 = vadd.f32 %v1898_v35, %v1897_v30  ;;  %v1900_v27 = vpop.f32.mrb[46].mxu1 }
 0x2bd   : > { %v1835_v38 = vadd.f32 %v1834_v43, %v1833_v32  ;;  %v1836_v45 = vpop.f32.mrb[46].mxu0  ;;  %v1901_v57 = vpop.f32.mrb[47].mxu1 }
 0x2be   : > { %v1837_v36 = vpop.f32.mrb[47].mxu0  ;;  %v1902_v37 = vadd.f32 %v1901_v57, %v1900_v27  ;;  %1466 = vst [vmem:[%s2901_s6 + $0x30] sm:$0xff] %v1899_v52 }
 0x2bf   : > { %v1838_v46 = vadd.f32 %v1837_v36, %v1836_v45  ;;  %1305 = vst [vmem:[%s2905_s18 + $0x30] sm:$0xff] %v1835_v38 }
 0x2c0   : > { %1467 = vst [vmem:[%s2901_s6 + $0x38] sm:$0xff] %v1902_v37 }
 0x2c1   : > { %1306 = vst [vmem:[%s2905_s18 + $0x38] sm:$0xff] %v1838_v46 }
 0x2c2   : > { %v1903_v40 = vpop.f32.mrb[48].mxu1 }
 0x2c3   : > { %v1839_v33 = vpop.f32.mrb[48].mxu0  ;;  %v1904_v34 = vpop.f32.mrb[49].mxu1 }
 0x2c4   : > { %v1840_v23 = vpop.f32.mrb[49].mxu0  ;;  %v1905_v31 = vadd.f32 %v1904_v34, %v1903_v40  ;;  %v1906_v41 = vpop.f32.mrb[50].mxu1 }
 0x2c5   : > { %v1841_v44 = vadd.f32 %v1840_v23, %v1839_v33  ;;  %v1842_v53 = vpop.f32.mrb[50].mxu0  ;;  %v1907_v61 = vpop.f32.mrb[51].mxu1 }
 0x2c6   : > { %v1843_v2 = vpop.f32.mrb[51].mxu0  ;;  %v1908_v9 = vadd.f32 %v1907_v61, %v1906_v41  ;;  %1468 = vst [vmem:[%s2901_s6 + $0x40] sm:$0xff] %v1905_v31 }
 0x2c7   : > { %v1844_v11 = vadd.f32 %v1843_v2, %v1842_v53  ;;  %1307 = vst [vmem:[%s2905_s18 + $0x40] sm:$0xff] %v1841_v44 }
 0x2c8   : > { %1469 = vst [vmem:[%s2901_s6 + $0x48] sm:$0xff] %v1908_v9 }
 0x2c9   : > { %1308 = vst [vmem:[%s2905_s18 + $0x48] sm:$0xff] %v1844_v11 }
 0x2ca   : > { %v1909_v15 = vpop.f32.mrb[52].mxu1 }
 0x2cb   : > { %v1845_v19 = vpop.f32.mrb[52].mxu0  ;;  %v1910_v20 = vpop.f32.mrb[53].mxu1 }
 0x2cc   : > { %v1846_v42 = vpop.f32.mrb[53].mxu0  ;;  %v1911_v58 = vadd.f32 %v1910_v20, %v1909_v15  ;;  %v1912_v48 = vpop.f32.mrb[54].mxu1 }
 0x2cd   : > { %v1847_v49 = vadd.f32 %v1846_v42, %v1845_v19  ;;  %v1848_v50 = vpop.f32.mrb[54].mxu0  ;;  %v1913_v51 = vpop.f32.mrb[55].mxu1 }
 0x2ce   : > { %v1849_v55 = vpop.f32.mrb[55].mxu0  ;;  %v1914_v59 = vadd.f32 %v1913_v51, %v1912_v48  ;;  %1470 = vst [vmem:[%s2901_s6 + $0x50] sm:$0xff] %v1911_v58 }
 0x2cf   : > { %v1850_v60 = vadd.f32 %v1849_v55, %v1848_v50  ;;  %1309 = vst [vmem:[%s2905_s18 + $0x50] sm:$0xff] %v1847_v49 }
 0x2d0   : > { %1471 = vst [vmem:[%s2901_s6 + $0x58] sm:$0xff] %v1914_v59 }
 0x2d1   : > { %1310 = vst [vmem:[%s2905_s18 + $0x58] sm:$0xff] %v1850_v60 }
 0x2d2   : > { %v1915_v39 = vpop.f32.mrb[56].mxu1 }
 0x2d3   : > { %v1851_v47 = vpop.f32.mrb[56].mxu0  ;;  %v1916_v54 = vpop.f32.mrb[57].mxu1 }
 0x2d4   : > { %v1852_v56 = vpop.f32.mrb[57].mxu0  ;;  %v1917_v62 = vadd.f32 %v1916_v54, %v1915_v39  ;;  %v1918_v0 = vpop.f32.mrb[58].mxu1 }
 0x2d5   : > { %v1853_v1 = vadd.f32 %v1852_v56, %v1851_v47  ;;  %v1854_v4 = vpop.f32.mrb[58].mxu0  ;;  %v1919_v5 = vpop.f32.mrb[59].mxu1 }
 0x2d6   : > { %v1855_v3 = vpop.f32.mrb[59].mxu0  ;;  %v1920_v12 = vadd.f32 %v1919_v5, %v1918_v0  ;;  %1472 = vst [vmem:[%s2901_s6 + $0x60] sm:$0xff] %v1917_v62 }
 0x2d7   : > { %v1856_v17 = vadd.f32 %v1855_v3, %v1854_v4  ;;  %1311 = vst [vmem:[%s2905_s18 + $0x60] sm:$0xff] %v1853_v1 }
 0x2d8   : > { %1473 = vst [vmem:[%s2901_s6 + $0x68] sm:$0xff] %v1920_v12 }
 0x2d9   : > { %1312 = vst [vmem:[%s2905_s18 + $0x68] sm:$0xff] %v1856_v17 }
 0x2da   : > { %v1921_v6 = vpop.f32.mrb[60].mxu1 }
 0x2db   : > { %v1857_v8 = vpop.f32.mrb[60].mxu0  ;;  %v1922_v10 = vpop.f32.mrb[61].mxu1 }
 0x2dc   : > { %v1858_v18 = vpop.f32.mrb[61].mxu0  ;;  %v1923_v13 = vadd.f32 %v1922_v10, %v1921_v6  ;;  %v1924_v21 = vpop.f32.mrb[62].mxu1 }
 0x2dd   : > { %v1859_v22 = vadd.f32 %v1858_v18, %v1857_v8  ;;  %v1860_v24 = vpop.f32.mrb[62].mxu0  ;;  %v1925_v25 = vpop.f32.mrb[63].mxu1 }
 0x2de   : > { %v1861_v26 = vpop.f32.mrb[63].mxu0  ;;  %v1926_v28 = vadd.f32 %v1925_v25, %v1924_v21  ;;  %1474 = vst [vmem:[%s2901_s6 + $0x70] sm:$0xff] %v1923_v13 }
 0x2df   : > { %v1862_v29 = vadd.f32 %v1861_v26, %v1860_v24  ;;  %1313 = vst [vmem:[%s2905_s18 + $0x70] sm:$0xff] %v1859_v22 }
 0x2e0   : > { %1475 = vst [vmem:[%s2901_s6 + $0x78] sm:$0xff] %v1926_v28 }
 0x2e1   : > { %1314 = vst [vmem:[%s2905_s18 + $0x78] sm:$0xff] %v1862_v29 }
 0x2e2   : > { %2311 = shalt.err (!%p2308_p0)
}
 0x2e3   : > { %s2312_s6 = scalar_lea.hbm %s2941_s23, 2048  ;;  %s2316_s21 = scalar_lea.hbm %s3039_s7, 4096 }
 0x2e4   : > { %p2313_p4 = scmp.ne.s32.totalorder %s2941_s23, %s2312_s6  ;;  %p2317_p12 = scmp.lt.u32.totalorder %s2941_s23, %s3039_s7 }
 0x2e5   : > { %p2318_p1 = scmp.lt.u32.totalorder %s2316_s21, %s2312_s6  ;;  %p2320_p13 = scmp.lt.u32.totalorder %s2312_s6, %s2941_s23 }
 0x2e6   : > { %p2314_p2 = pnand %p2313_p4, %p2634_p3 }
 0x2e7   : > { %p2319_p7 = por %p2318_p1, %p2317_p12 }
 0x2e8   : > { %p2315_p8 = pneg %p2314_p2 }
 0x2e9   : > { %p2321_p6 = por %p2320_p13, %p2319_p7 }
 0x2eb   : > { %p2322_p10 = pnand %p2321_p6, %p2315_p8 }
 0x2ed   : > { %2325 = shalt.err (!%p2322_p10)
}
 0x2ee   : > { %s2431_s27 = smov 128   ;;  %s2432_s9 = smov 8  }
 0x2ef   : > { %2038 = dma.vmem_to_hbm [thread:$0]  (%p2634_p3), %s2943_s16, 2048, %s2941_s23, %s1482_s17, %s2431_s27, %s2431_s27, %s2432_s9  }
 0x2f0   : > { %s1477_s11 = scalar_lea.sflag [#allocation4], %s2693_s22  ;;  %s2326_s13 = scalar_lea.vmem %s2951_s15, 2048 }
 0x2f1   : > { %p2327_p11 = scmp.ne.s32.totalorder %s2951_s15, %s2326_s13  ;;  %s2433_s24 = smov [#allocation10]  }
 0x2f2   : > { %s2330_s6 = sshll.u32 %s2433_s24, 4  ;;  %s2331_s6 = int_to_ptr.vmem [resolvable:$false] %s2330_s6 }
 0x2f3   : > { %p2328_p5 = pnand %p2327_p11, %p2634_p3  ;;  %s2332_s18 = scalar_lea.vmem %s2331_s6, 4096 }
 0x2f4   : > { %p2333_p0 = scmp.lt.s32.totalorder %s2951_s15, %s2331_s6  ;;  %p2334_p4 = scmp.lt.s32.totalorder %s2332_s18, %s2326_s13 }
 0x2f5   : > { %p2329_p9 = pneg %p2328_p5 }
 0x2f6   : > { %p2335_p2 = por %p2334_p4, %p2333_p0 }
 0x2f8   : > { %p2336_p8 = pnand %p2335_p2, %p2329_p9 }
 0x2fa   : > { %2339 = shalt.err (!%p2336_p8)
}
 0x2fb   : > { %s2340_s16 = scalar_lea.hbm %s2949_s12, 2048  ;;  %s2344_s1 = scalar_lea.hbm %s3066_s19, 4096 }
 0x2fc   : > { %p2341_p12 = scmp.ne.s32.totalorder %s2949_s12, %s2340_s16  ;;  %p2345_p13 = scmp.lt.u32.totalorder %s2949_s12, %s3066_s19 }
 0x2fd   : > { %p2346_p6 = scmp.lt.u32.totalorder %s2344_s1, %s2340_s16  ;;  %p2348_p11 = scmp.lt.u32.totalorder %s2340_s16, %s2949_s12 }
 0x2fe   : > { %p2342_p1 = pnand %p2341_p12, %p2634_p3 }
 0x2ff   : > { %p2347_p10 = por %p2346_p6, %p2345_p13 }
 0x300   : > { %p2343_p7 = pneg %p2342_p1 }
 0x301   : > { %p2349_p5 = por %p2348_p11, %p2347_p10 }
 0x303   : > { %p2350_p9 = pnand %p2349_p5, %p2343_p7 }
 0x305   : > { %2353 = shalt.err (!%p2350_p9)
}
 0x306   : > { %2037 = dma.vmem_to_hbm [thread:$0]  (%p2634_p3), %s2951_s15, 2048, %s2949_s12, %s1477_s11, %s2431_s27, %s2431_s27, %s2432_s9  }
 0x307 PF: > { %s3067_s14 = sld [smem:[#allocation18_spill]]  ;;  %s3068_s13 = sld [smem:[#allocation19_spill]] }
 0x308   : > { %p3070_p4 = scmp.ge.s32.totalorder %s2420_s29, 2 }
 0x30d   : > { %s1530_s24 = sand.u32 1, %s3067_s14   ;;  %p3069_p0 = scmp.ne.s32.totalorder %s3068_s13, 0 }
 0x30e   : > { %s1531_s6 = scalar_lea.sflag [#allocation4], %s1530_s24 }
 0x30f   : > { %p2056_p2 = pnand %p3070_p4, %p3069_p0 }
 0x311   : > { %2391 = dma.done.wait (!%p2056_p2), %s1531_s6, 2048  }
 0x312   : > { %2393 = vsyncadd (!%p2056_p2), %s1531_s6, 4294965248  ;;  %s1540_s20 = scalar_lea.sflag [#allocation12], %s1530_s24 }
 0x313   : > { %2395 = dma.done.wait (!%p2056_p2), %s1540_s20, 2048  }
 0x314   : > { %2397 = vsyncadd (!%p2056_p2), %s1540_s20, 4294965248  ;;  %s29_s29 = sadd.s32 1, %s2420_s29   ;;  %s3071_s24 = smov %s2404_s25 }
 0x315   : > { %p26_p8 = scmp.ge.s32.totalorder %s29_s29, 4   ;;  %s3072_s25 = smov %s2408_s26 }
 0x316   : > { %s3073_s26 = smov %s2643_s8  ;;  %s3074_s27 = smov %s2416_s28 }
 0x317   : > { %s3075_s28 = smov %s3077_s30  ;;  %28 = sbr.rel (!%p26_p8) target bundleno = 13 (0xd), region = 123 }
 0x31e   :  { %1545 = vsyncpa [#allocation3], 1 }
 0x31f   :  { %1547 = vsyncpa [#allocation3 + $0x1], 1 }
 0x320   :  { %1548 = vsyncpa [#allocation6], 1 }
 0x321   :  { %1549 = vsyncpa [#allocation9], 1 }
 0x322   :  { %1550 = vsyncpa [#allocation4], 1 }
 0x323   :  { %1552 = vsyncpa [#allocation4 + $0x1], 1 }
 0x324   :  { %1553 = vsyncpa [#allocation12], 1 }
 0x325   :  { %1555 = vsyncpa [#allocation12 + $0x1], 1 }

</bundles_post_ra>
